<compile_context>
chip_gen: v6e
topology: v6e:2x2x1
jax: 0.10.0
libtpu: 0.0.40
codegen_flags: <defaults>
</compile_context>

<pallas_src>
import functools

import jax
import jax.numpy as jnp
from jax.experimental import pallas as pl
from jax.experimental.pallas import tpu as pltpu

FEAT_DIM = 768            # ViT-DINO (ViT-B/16) embedding dim
NUM_LABELLED = 98
NUM_UNLABELLED = 98
HEAD_PAD = 256            # lane-dense padded width for the fused head matmul
PATCH = 16                # stand-in backbone patch size


def _pick_tile(dim, preferred):
    """Largest divisor of `dim` <= preferred that is 8-aligned (or == dim)."""
    if dim <= preferred:
        return dim
    for t in range(preferred, 0, -1):
        if dim % t == 0 and (t % 8 == 0 or t == dim):
            return t
    return dim


# -----------------------------------------------------------------------------
# Fused kernel.
#   grid axis 0: batch tiles   ("parallel")
#   grid axis 1: token tiles   ("arbitrary" reduction; pooled-sum accumulator)
# Per step: bf16 patch-embed matmul on the MXU (f32 accumulate) + token-sum
# into a (B_tile, 768) f32 VMEM scratch.  Last token step: scaled-sum mean,
# relu, one lane-dense (768 x 256) head matmul ([head1 | head2 | pad]), bias.
# -----------------------------------------------------------------------------
def _fused_kernel(p_ref, we_ref, wc_ref, bc_ref,
                  logits_ref, feat_ref, acc_ref, *, tokens_total):
    t = pl.program_id(1)

    @pl.when(t == 0)
    def _init():
        acc_ref[...] = jnp.zeros_like(acc_ref)

    # Backbone stand-in: per-token patch embedding (bf16 in, f32 accumulate),
    # then token-sum into the pooled accumulator.
    # TODO(synk): the real DINO ViT backbone (transformer blocks, CLS token)
    # is an external module and is not reproduced; this patch-embed + mean
    # token pool stands in for it.
    p = p_ref[...]                                     # (Bt, Tt, Din) bf16
    bt, tt, d_in = p.shape
    e = jnp.dot(p.reshape(bt * tt, d_in), we_ref[...],
                preferred_element_type=jnp.float32)    # (Bt*Tt, F) f32
    acc_ref[...] += e.reshape(bt, tt, FEAT_DIM).sum(axis=1)

    @pl.when(t == pl.num_programs(1) - 1)
    def _finalize():
        # mean over tokens as a scaled sum, relu in f32.
        h = jnp.maximum(acc_ref[...] * (1.0 / tokens_total), 0.0)  # (Bt, F)
        feat_ref[...] = h
        logits_ref[...] = (jnp.dot(h.astype(wc_ref.dtype), wc_ref[...],
                                   preferred_element_type=jnp.float32)
                           + bc_ref[...])


def vit_dino_wrapper_forward(x_nchw, params):
    """Returns (out1, out2, relu_features), matching ViTDINOWrapper.forward."""
    B, Cin, H, W = x_nchw.shape
    Hp, Wp = H // PATCH, W // PATCH
    T = Hp * Wp
    D_in = Cin * PATCH * PATCH

    # Patch extraction stays in XLA glue (one extra HBM pass over the input
    # image); the (8,128) tiling rules prevent expressing the 16x16 window
    # gather directly in a BlockSpec index_map.
    xp = x_nchw.reshape(B, Cin, Hp, PATCH, Wp, PATCH)
    xp = jnp.transpose(xp, (0, 2, 4, 1, 3, 5))               # (B,Hp,Wp,Cin,P,P)
    patches = xp.reshape(B, T, D_in).astype(jnp.bfloat16)    # channels-last tokens

    # Packed head weights: [head1 | head2 | zero-pad] -> lane-dense 256 cols.
    w_cat = jnp.zeros((FEAT_DIM, HEAD_PAD), jnp.float32)
    w_cat = w_cat.at[:, :NUM_LABELLED].set(params["w1"])
    w_cat = w_cat.at[:, NUM_LABELLED:NUM_LABELLED + NUM_UNLABELLED].set(params["w2"])
    w_cat = w_cat.astype(jnp.bfloat16)
    b_cat = jnp.zeros((1, HEAD_PAD), jnp.float32)
    b_cat = b_cat.at[:, :NUM_LABELLED].set(params["b1"])
    b_cat = b_cat.at[:, NUM_LABELLED:NUM_LABELLED + NUM_UNLABELLED].set(params["b2"])

    w_embed = params["w_embed"].astype(jnp.bfloat16)

    B_TILE = _pick_tile(B, 8)       # output sublane-dim tile (8-aligned or full)
    T_TILE = _pick_tile(T, 256)     # reduction-axis tile
    grid = (B // B_TILE, T // T_TILE)

    kernel = functools.partial(_fused_kernel, tokens_total=float(T))

    logits, feat = pl.pallas_call(
        kernel,
        out_shape=(
            jax.ShapeDtypeStruct((B, HEAD_PAD), jnp.float32),
            jax.ShapeDtypeStruct((B, FEAT_DIM), jnp.float32),
        ),
        grid=grid,
        in_specs=[
            pl.BlockSpec((B_TILE, T_TILE, D_in), lambda b, t: (b, t, 0)),
            pl.BlockSpec((D_in, FEAT_DIM), lambda b, t: (0, 0)),
            pl.BlockSpec((FEAT_DIM, HEAD_PAD), lambda b, t: (0, 0)),
            pl.BlockSpec((1, HEAD_PAD), lambda b, t: (0, 0)),
        ],
        out_specs=(
            pl.BlockSpec((B_TILE, HEAD_PAD), lambda b, t: (b, 0)),
            pl.BlockSpec((B_TILE, FEAT_DIM), lambda b, t: (b, 0)),
        ),
        scratch_shapes=[pltpu.VMEM((B_TILE, FEAT_DIM), jnp.float32)],
        compiler_params=pltpu.CompilerParams(
            dimension_semantics=("parallel", "arbitrary"),
            vmem_limit_bytes=32 * 1024 * 1024),
    )(patches, w_embed, w_cat, b_cat)

    out1 = logits[:, :NUM_LABELLED]
    out2 = logits[:, NUM_LABELLED:NUM_LABELLED + NUM_UNLABELLED]
    return out1, out2, feat


def init_params(key, in_channels=3):
    """Deterministic synthetic parameters (no checkpoint loading)."""
    k0, k1, k2, k3, k4 = jax.random.split(key, 5)
    d_in = in_channels * PATCH * PATCH
    return {
        # stand-in backbone patch-embed projection
        "w_embed": jax.random.normal(k0, (d_in, FEAT_DIM), jnp.float32)
                   * (1.0 / jnp.sqrt(d_in)),
        # head1 / head2 stored as weight.T => (in, out); biases as (1, out)
        "w1": jax.random.normal(k1, (FEAT_DIM, NUM_LABELLED), jnp.float32)
              * (1.0 / jnp.sqrt(FEAT_DIM)),
        "b1": jax.random.normal(k2, (1, NUM_LABELLED), jnp.float32) * 0.01,
        "w2": jax.random.normal(k3, (FEAT_DIM, NUM_UNLABELLED), jnp.float32)
              * (1.0 / jnp.sqrt(FEAT_DIM)),
        "b2": jax.random.normal(k4, (1, NUM_UNLABELLED), jnp.float32) * 0.01,
    }


def reference_forward(x_nchw, params):
    """Plain-JAX reference with the same bf16-operand / f32-accumulate numerics."""
    B, Cin, H, W = x_nchw.shape
    Hp, Wp = H // PATCH, W // PATCH
    xp = x_nchw.reshape(B, Cin, Hp, PATCH, Wp, PATCH)
    xp = jnp.transpose(xp, (0, 2, 4, 1, 3, 5)).reshape(B, Hp * Wp, -1)
    p = xp.astype(jnp.bfloat16).astype(jnp.float32)
    we = params["w_embed"].astype(jnp.bfloat16).astype(jnp.float32)
    tokens = jnp.einsum("btd,df->btf", p, we)
    h = jnp.maximum(jnp.mean(tokens, axis=1), 0.0)
    hb = h.astype(jnp.bfloat16).astype(jnp.float32)
    w1 = params["w1"].astype(jnp.bfloat16).astype(jnp.float32)
    w2 = params["w2"].astype(jnp.bfloat16).astype(jnp.float32)
    out1 = hb @ w1 + params["b1"]
    out2 = hb @ w2 + params["b2"]
    return out1, out2, h


if __name__ == "__main__":
    key = jax.random.PRNGKey(0)
    kx, kp = jax.random.split(key)

    # Small NCHW image; stand-in backbone -> 2x2 = 4 patch tokens of dim 768.
    x = jax.random.normal(kx, (2, 3, 32, 32), jnp.float32)
    params = init_params(kp, in_channels=3)

    fwd = jax.jit(vit_dino_wrapper_forward)
    out1, out2, feat = jax.block_until_ready(fwd(x, params))

    # Sanity check against the plain-JAX reference.
    r1, r2, rf = reference_forward(x, params)
    assert out1.shape == (2, NUM_LABELLED)
    assert out2.shape == (2, NUM_UNLABELLED)
    assert feat.shape == (2, FEAT_DIM)
    assert jnp.allclose(feat, rf, atol=1e-2, rtol=1e-2), \
        float(jnp.max(jnp.abs(feat - rf)))
    assert jnp.allclose(out1, r1, atol=1e-2, rtol=1e-2), \
        float(jnp.max(jnp.abs(out1 - r1)))
    assert jnp.allclose(out2, r2, atol=1e-2, rtol=1e-2), \
        float(jnp.max(jnp.abs(out2 - r2)))

    print("KERNEL_OK")
</pallas_src>

<mosaic_0001>
module attributes {stable_mosaic.version = 11 : i64} {
  func.func @_fused_kernel(%arg0: i32, %arg1: i32, %arg2: memref<2x4x768xbf16, #tpu.memory_space<vmem>>, %arg3: memref<768x768xbf16, #tpu.memory_space<vmem>>, %arg4: memref<768x256xbf16, #tpu.memory_space<vmem>>, %arg5: memref<1x256xf32, #tpu.memory_space<vmem>>, %arg6: memref<2x256xf32, #tpu.memory_space<vmem>>, %arg7: memref<2x768xf32, #tpu.memory_space<vmem>>, %arg8: memref<2x768xf32, #tpu.memory_space<vmem>>) attributes {dimension_semantics = [#tpu.dimension_semantics<parallel>, #tpu.dimension_semantics<arbitrary>], iteration_bounds = array<i64: 1, 1>, scalar_prefetch = 0 : i64, scratch_operands = 1 : i64, tpu.core_type = #tpu.core_type<tc>, window_params = [{transform_indices = @transform_0, window_bounds = array<i64: 2, 4, 768>}, {pipeline_mode = #tpu.pipeline_mode<synchronous>, transform_indices = @transform_1, window_bounds = array<i64: 768, 768>}, {pipeline_mode = #tpu.pipeline_mode<synchronous>, transform_indices = @transform_2, window_bounds = array<i64: 768, 256>}, {pipeline_mode = #tpu.pipeline_mode<synchronous>, transform_indices = @transform_3, window_bounds = array<i64: 1, 256>}, {transform_indices = @transform_4, window_bounds = array<i64: 2, 256>}, {transform_indices = @transform_5, window_bounds = array<i64: 2, 768>}]} {
    %c0_i32 = arith.constant 0 : i32
    %0 = arith.cmpi eq, %arg1, %c0_i32 : i32
    %1 = arith.extui %0 : i1 to i32
    %c0_i32_0 = arith.constant 0 : i32
    %2 = arith.cmpi ne, %1, %c0_i32_0 : i32
    scf.if %2 {
      %cst_12 = arith.constant 0.000000e+00 : f32
      %15 = vector.broadcast %cst_12 : f32 to vector<2x768xf32>
      %c0_13 = arith.constant 0 : index
      %c0_14 = arith.constant 0 : index
      %16 = vector.load %arg8[%c0_13, %c0_14] : memref<2x768xf32, #tpu.memory_space<vmem>>, vector<2x768xf32>
      tpu.vector_store %arg8[%c0_13, %c0_14], %15 {strides = array<i32>} : memref<2x768xf32, #tpu.memory_space<vmem>>, vector<2x768xf32>,
    } else {
    }
    %c0 = arith.constant 0 : index
    %c0_1 = arith.constant 0 : index
    %c0_2 = arith.constant 0 : index
    %3 = vector.load %arg2[%c0, %c0_1, %c0_2] : memref<2x4x768xbf16, #tpu.memory_space<vmem>>, vector<2x4x768xbf16>
    %4 = vector.shape_cast %3 : vector<2x4x768xbf16> to vector<8x768xbf16>
    %c0_3 = arith.constant 0 : index
    %c0_4 = arith.constant 0 : index
    %5 = vector.load %arg3[%c0_3, %c0_4] : memref<768x768xbf16, #tpu.memory_space<vmem>>, vector<768x768xbf16>
    %cst = arith.constant dense<0.000000e+00> : vector<8x768xf32>
    %6 = tpu.matmul %4, %5, %cst {dimension_numbers = #tpu.dot_dimension_numbers<[1], [0], [0], [1], [0, 0, 1, 1], [], []>} : vector<8x768xbf16>, vector<768x768xbf16>, vector<8x768xf32> -> vector<8x768xf32>
    %c0_5 = arith.constant 0 : index
    %c0_6 = arith.constant 0 : index
    %7 = vector.load %arg8[%c0_5, %c0_6] : memref<2x768xf32, #tpu.memory_space<vmem>>, vector<2x768xf32>
    %8 = vector.shape_cast %6 : vector<8x768xf32> to vector<2x4x768xf32>
    %cst_7 = arith.constant dense<0.000000e+00> : vector<2x768xf32>
    %9 = vector.multi_reduction <add>, %8, %cst_7 [1] : vector<2x4x768xf32> to vector<2x768xf32>
    %10 = arith.addf %7, %9 : vector<2x768xf32>
    %c0_8 = arith.constant 0 : index
    %c0_9 = arith.constant 0 : index
    %11 = vector.load %arg8[%c0_8, %c0_9] : memref<2x768xf32, #tpu.memory_space<vmem>>, vector<2x768xf32>
    tpu.vector_store %arg8[%c0_8, %c0_9], %10 {strides = array<i32>} : memref<2x768xf32, #tpu.memory_space<vmem>>, vector<2x768xf32>,
    %c0_i32_10 = arith.constant 0 : i32
    %12 = arith.cmpi eq, %arg1, %c0_i32_10 : i32
    %13 = arith.extui %12 : i1 to i32
    %c0_i32_11 = arith.constant 0 : i32
    %14 = arith.cmpi ne, %13, %c0_i32_11 : i32
    scf.if %14 {
      %c0_12 = arith.constant 0 : index
      %c0_13 = arith.constant 0 : index
      %15 = vector.load %arg8[%c0_12, %c0_13] : memref<2x768xf32, #tpu.memory_space<vmem>>, vector<2x768xf32>
      %cst_14 = arith.constant 2.500000e-01 : f32
      %16 = vector.broadcast %cst_14 : f32 to vector<2x768xf32>
      %17 = arith.mulf %15, %16 : vector<2x768xf32>
      %cst_15 = arith.constant 0.000000e+00 : f32
      %18 = vector.broadcast %cst_15 : f32 to vector<2x768xf32>
      %19 = arith.maximumf %17, %18 : vector<2x768xf32>
      %c0_16 = arith.constant 0 : index
      %c0_17 = arith.constant 0 : index
      %20 = vector.load %arg7[%c0_16, %c0_17] : memref<2x768xf32, #tpu.memory_space<vmem>>, vector<2x768xf32>
      tpu.vector_store %arg7[%c0_16, %c0_17], %19 {strides = array<i32>} : memref<2x768xf32, #tpu.memory_space<vmem>>, vector<2x768xf32>,
      %21 = arith.truncf %19 : vector<2x768xf32> to vector<2x768xbf16>
      %c0_18 = arith.constant 0 : index
      %c0_19 = arith.constant 0 : index
      %22 = vector.load %arg4[%c0_18, %c0_19] : memref<768x256xbf16, #tpu.memory_space<vmem>>, vector<768x256xbf16>
      %cst_20 = arith.constant dense<0.000000e+00> : vector<2x256xf32>
      %23 = tpu.matmul %21, %22, %cst_20 {dimension_numbers = #tpu.dot_dimension_numbers<[1], [0], [0], [1], [0, 0, 1, 1], [], []>} : vector<2x768xbf16>, vector<768x256xbf16>, vector<2x256xf32> -> vector<2x256xf32>
      %c0_21 = arith.constant 0 : index
      %c0_22 = arith.constant 0 : index
      %24 = vector.load %arg5[%c0_21, %c0_22] : memref<1x256xf32, #tpu.memory_space<vmem>>, vector<1x256xf32>
      %25 = vector.broadcast %24 : vector<1x256xf32> to vector<2x256xf32>
      %26 = arith.addf %23, %25 : vector<2x256xf32>
      %c0_23 = arith.constant 0 : index
      %c0_24 = arith.constant 0 : index
      %27 = vector.load %arg6[%c0_23, %c0_24] : memref<2x256xf32, #tpu.memory_space<vmem>>, vector<2x256xf32>
      tpu.vector_store %arg6[%c0_23, %c0_24], %26 {strides = array<i32>} : memref<2x256xf32, #tpu.memory_space<vmem>>, vector<2x256xf32>,
    } else {
    }
    return
  }
  func.func @transform_0(%arg0: i32, %arg1: i32) -> (i32, i32, i32) {
    %c0_i32 = arith.constant 0 : i32
    %c0_i32_0 = arith.constant 0 : i32
    return %arg0, %arg1, %c0_i32 : i32, i32, i32
  }
  func.func @transform_1(%arg0: i32, %arg1: i32) -> (i32, i32) {
    %c0_i32 = arith.constant 0 : i32
    %c0_i32_0 = arith.constant 0 : i32
    %c0_i32_1 = arith.constant 0 : i32
    return %c0_i32, %c0_i32_0 : i32, i32
  }
  func.func @transform_2(%arg0: i32, %arg1: i32) -> (i32, i32) {
    %c0_i32 = arith.constant 0 : i32
    %c0_i32_0 = arith.constant 0 : i32
    %c0_i32_1 = arith.constant 0 : i32
    return %c0_i32, %c0_i32_0 : i32, i32
  }
  func.func @transform_3(%arg0: i32, %arg1: i32) -> (i32, i32) {
    %c0_i32 = arith.constant 0 : i32
    %c0_i32_0 = arith.constant 0 : i32
    %c0_i32_1 = arith.constant 0 : i32
    return %c0_i32, %c0_i32_0 : i32, i32
  }
  func.func @transform_4(%arg0: i32, %arg1: i32) -> (i32, i32) {
    %c0_i32 = arith.constant 0 : i32
    %c0_i32_0 = arith.constant 0 : i32
    return %arg0, %c0_i32 : i32, i32
  }
  func.func @transform_5(%arg0: i32, %arg1: i32) -> (i32, i32) {
    %c0_i32 = arith.constant 0 : i32
    %c0_i32_0 = arith.constant 0 : i32
    return %arg0, %c0_i32 : i32, i32
  }
}

</mosaic_0001>

<bundles_post_ra>
// kernel: vit_dino_wrapper_forward.1
= control target key start
LH: loop header
LB: loop body
LE: loop exit
PB: predicated region body
PF: predicated region fallthrough
CT: control target
= control target key end

     0   :  { %v4156_v38 = vmov 1983009808   ;;  %v327_v40 = vlaneseq  ;;  %s5464_s0 = inlined_call_operand.vmem [shape: bf16[2,4,768], index: 0, kind: input, shape index: {}]   ;;  %s5465_s1 = inlined_call_operand.vmem [shape: bf16[768,768], index: 1, kind: input, shape index: {}]   ;;  %s5466_s2 = inlined_call_operand.vmem [shape: bf16[768,256], index: 2, kind: input, shape index: {}]   ;;  %s5467_s3 = inlined_call_operand.vmem [shape: f32[1,256], index: 3, kind: input, shape index: {}]   ;;  %s5468_s4 = inlined_call_operand.vmem [shape: f32[2,256], index: 4, kind: output, shape index: {0}]   ;;  %s5469_s5 = inlined_call_operand.hbm [shape: f32[2,768], index: 5, kind: output, shape index: {1}]  }
   0x1   :  { %v3554_v0 = vld [vmem:[%s5465_s1 + $0x154] ss:$24 sps:$4 sm:$0xff]   ;;  %v3558_v2 = vld [vmem:[%s5465_s1 + $0x150] ss:$24 sps:$4 sm:$0xff]   ;;  %v3560_v4 = vld [vmem:[%s5465_s1 + $0x124] ss:$24 sps:$4 sm:$0xff]   ;;  %v325_v39 = vunpack.c.l.s4 %v4156_v38 }
   0x2   :  { %v3556_v1 = vld [vmem:[%s5465_s1 + $0x454] ss:$24 sps:$4 sm:$0xff]   ;;  %1795 = vmatprep.subr.bf16.mxu0 %v3554_v0  ;;  %v3559_v3 = vld [vmem:[%s5465_s1 + $0x450] ss:$24 sps:$4 sm:$0xff]   ;;  %v3562_v5 = vld [vmem:[%s5465_s1 + $0x424] ss:$24 sps:$4 sm:$0xff]  }
   0x3   :  { %1836 = vmatprep.subr.bf16.mxu1 %v3556_v1  ;;  %1796 = vmatpush1.bf16.msra.mxu0 %v3558_v2  ;;  %v3564_v6 = vld [vmem:[%s5465_s1 + $0x120] ss:$24 sps:$4 sm:$0xff]   ;;  %v3566_v8 = vld [vmem:[%s5465_s1 + $0xf4] ss:$24 sps:$4 sm:$0xff]   ;;  %v3570_v10 = vld [vmem:[%s5465_s1 + $0xf0] ss:$24 sps:$4 sm:$0xff]   ;;  %v326_v45 = vunpack.c.0.s8 %v325_v39 }
   0x4   :  { %1837 = vmatpush1.bf16.msra.mxu1 %v3559_v3  ;;  %1797 = vmatprep.subr.bf16.mxu0 %v3560_v4  ;;  %v3565_v7 = vld [vmem:[%s5465_s1 + $0x420] ss:$24 sps:$4 sm:$0xff]   ;;  %v3568_v9 = vld [vmem:[%s5465_s1 + $0x3f4] ss:$24 sps:$4 sm:$0xff]   ;;  %v3571_v11 = vld [vmem:[%s5465_s1 + $0x3f0] ss:$24 sps:$4 sm:$0xff]  }
   0x5   :  { %1838 = vmatprep.subr.bf16.mxu1 %v3562_v5  ;;  %v3572_v12 = vld [vmem:[%s5465_s1 + $0xc4] ss:$24 sps:$4 sm:$0xff]   ;;  %v3576_v14 = vld [vmem:[%s5465_s1 + $0xc0] ss:$24 sps:$4 sm:$0xff]   ;;  %v3578_v16 = vld [vmem:[%s5465_s1 + $0x94] ss:$24 sps:$4 sm:$0xff]  }
   0x6   :  { %v3574_v13 = vld [vmem:[%s5465_s1 + $0x3c4] ss:$24 sps:$4 sm:$0xff]   ;;  %v3577_v15 = vld [vmem:[%s5465_s1 + $0x3c0] ss:$24 sps:$4 sm:$0xff]   ;;  %v3580_v17 = vld [vmem:[%s5465_s1 + $0x394] ss:$24 sps:$4 sm:$0xff]  }
   0x7   :  { %1798 = vmatpush1.bf16.msra.mxu0 %v3564_v6  ;;  %v3582_v18 = vld [vmem:[%s5465_s1 + $0x90] ss:$24 sps:$4 sm:$0xff]   ;;  %v3584_v20 = vld [vmem:[%s5465_s1 + $0x64] ss:$24 sps:$4 sm:$0xff]   ;;  %v3588_v22 = vld [vmem:[%s5465_s1 + $0x60] ss:$24 sps:$4 sm:$0xff]  }
   0x8   :  { %1839 = vmatpush1.bf16.msra.mxu1 %v3565_v7  ;;  %1799 = vmatprep.subr.bf16.mxu0 %v3566_v8  ;;  %v3583_v19 = vld [vmem:[%s5465_s1 + $0x390] ss:$24 sps:$4 sm:$0xff]   ;;  %v3586_v21 = vld [vmem:[%s5465_s1 + $0x364] ss:$24 sps:$4 sm:$0xff]   ;;  %v3589_v23 = vld [vmem:[%s5465_s1 + $0x360] ss:$24 sps:$4 sm:$0xff]  }
   0x9   :  { %1840 = vmatprep.subr.bf16.mxu1 %v3568_v9  ;;  %v3590_v24 = vld [vmem:[%s5465_s1 + $0x34] ss:$24 sps:$4 sm:$0xff]   ;;  %v3594_v26 = vld [vmem:[%s5465_s1 + $0x30] ss:$24 sps:$4 sm:$0xff]   ;;  %v3596_v28 = vld [vmem:[%s5465_s1 + $0x4] ss:$24 sps:$4 sm:$0xff]  }
   0xa   :  { %v3592_v25 = vld [vmem:[%s5465_s1 + $0x334] ss:$24 sps:$4 sm:$0xff]   ;;  %v3595_v27 = vld [vmem:[%s5465_s1 + $0x330] ss:$24 sps:$4 sm:$0xff]   ;;  %v3598_v29 = vld [vmem:[%s5465_s1 + $0x304] ss:$24 sps:$4 sm:$0xff]  }
   0xb   :  { %1800 = vmatpush1.bf16.msra.mxu0 %v3570_v10  ;;  %v3600_v30 = vld [vmem:[%s5465_s1] ss:$24 sps:$4 sm:$0xff]   ;;  %v3602_v32 = vld [vmem:[%s5465_s1 + $0x2d4] ss:$24 sps:$4 sm:$0xff]   ;;  %v3606_v34 = vld [vmem:[%s5465_s1 + $0x2d0] ss:$24 sps:$4 sm:$0xff]  }
   0xc   :  { %1841 = vmatpush1.bf16.msra.mxu1 %v3571_v11  ;;  %1801 = vmatprep.subr.bf16.mxu0 %v3572_v12  ;;  %v3601_v31 = vld [vmem:[%s5465_s1 + $0x300] ss:$24 sps:$4 sm:$0xff]   ;;  %v3604_v33 = vld [vmem:[%s5465_s1 + $0x5d4] ss:$24 sps:$4 sm:$0xff]   ;;  %v3607_v35 = vld [vmem:[%s5465_s1 + $0x5d0] ss:$24 sps:$4 sm:$0xff]  }
   0xd   :  { %1842 = vmatprep.subr.bf16.mxu1 %v3574_v13  ;;  %v3608_v36 = vld [vmem:[%s5465_s1 + $0x2a4] ss:$24 sps:$4 sm:$0xff]   ;;  %v3612_v41 = vld [vmem:[%s5465_s1 + $0x2a0] ss:$24 sps:$4 sm:$0xff]   ;;  %v3614_v43 = vld [vmem:[%s5465_s1 + $0x274] ss:$24 sps:$4 sm:$0xff]  }
   0xe   :  { %v3610_v37 = vld [vmem:[%s5465_s1 + $0x5a4] ss:$24 sps:$4 sm:$0xff]   ;;  %v3613_v42 = vld [vmem:[%s5465_s1 + $0x5a0] ss:$24 sps:$4 sm:$0xff]   ;;  %v3616_v44 = vld [vmem:[%s5465_s1 + $0x574] ss:$24 sps:$4 sm:$0xff]  }
   0xf   :  { %1802 = vmatpush1.bf16.msra.mxu0 %v3576_v14  ;;  %v4315_v46 = vshrl.u32 %v327_v40, 7  ;;  %v3618_v47 = vld [vmem:[%s5465_s1 + $0x270] ss:$24 sps:$4 sm:$0xff]   ;;  %v3620_v49 = vld [vmem:[%s5465_s1 + $0x244] ss:$24 sps:$4 sm:$0xff]  }
  0x10   :  { %1843 = vmatpush1.bf16.msra.mxu1 %v3577_v15  ;;  %1803 = vmatprep.subr.bf16.mxu0 %v3578_v16  ;;  %v3619_v48 = vld [vmem:[%s5465_s1 + $0x570] ss:$24 sps:$4 sm:$0xff]   ;;  %v3622_v50 = vld [vmem:[%s5465_s1 + $0x544] ss:$24 sps:$4 sm:$0xff]   ;;  %v3624_v52 = vld [vmem:[%s5465_s1 + $0x240] ss:$24 sps:$4 sm:$0xff]  }
  0x11   :  { %1844 = vmatprep.subr.bf16.mxu1 %v3580_v17  ;;  %v4330_v51 = vsub.s32 %v326_v45, %v4315_v46  ;;  %v3625_v53 = vld [vmem:[%s5465_s1 + $0x540] ss:$24 sps:$4 sm:$0xff]   ;;  %v3652_v55 = vld [vmem:[%s5464_s0 + $0x4] ss:$12 sps:$4 sm:$0xff]   ;;  %v3626_v56 = vld [vmem:[%s5465_s1 + $0x214] ss:$24 sps:$4 sm:$0xff]  }
  0x12   :  { %v3650_v54 = vld [vmem:[%s5464_s0] ss:$12 sps:$4 sm:$0xff]   ;;  %v3630_v60 = vld [vmem:[%s5465_s1 + $0x210] ss:$24 sps:$4 sm:$0xff]   ;;  %v3632_v0 = vld [vmem:[%s5465_s1 + $0x1e4] ss:$24 sps:$4 sm:$0xff]  }
  0x13   :  { %1804 = vmatpush1.bf16.msra.mxu0 %v3582_v18  ;;  %v3628_v57 = vld [vmem:[%s5465_s1 + $0x514] ss:$24 sps:$4 sm:$0xff]   ;;  %v4351_v58 = vrot.slane %v3650_v54, %v4330_v51  ;;  %v4354_v59 = vrot.slane %v3652_v55, %v4330_v51  ;;  %v3631_v61 = vld [vmem:[%s5465_s1 + $0x510] ss:$24 sps:$4 sm:$0xff]   ;;  %v3634_v1 = vld [vmem:[%s5465_s1 + $0x4e4] ss:$24 sps:$4 sm:$0xff]  }
  0x14   :  { %1845 = vmatpush1.bf16.msra.mxu1 %v3583_v19  ;;  %1805 = vmatprep.subr.bf16.mxu0 %v3584_v20  ;;  %v3636_v2 = vld [vmem:[%s5465_s1 + $0x1e0] ss:$24 sps:$4 sm:$0xff]   ;;  %v3638_v4 = vld [vmem:[%s5465_s1 + $0x1b4] ss:$24 sps:$4 sm:$0xff]   ;;  %v3642_v6 = vld [vmem:[%s5465_s1 + $0x1b0] ss:$24 sps:$4 sm:$0xff]  }
  0x15   :  { %1846 = vmatprep.subr.bf16.mxu1 %v3586_v21  ;;  %v4364_v62 = vcombine.high %v4351_v58, %v4351_v58  ;;  %v4368_v63 = vcombine.high %v4354_v59, %v4354_v59  ;;  %v3637_v3 = vld [vmem:[%s5465_s1 + $0x4e0] ss:$24 sps:$4 sm:$0xff]   ;;  %v3640_v5 = vld [vmem:[%s5465_s1 + $0x4b4] ss:$24 sps:$4 sm:$0xff]   ;;  %v3643_v7 = vld [vmem:[%s5465_s1 + $0x4b0] ss:$24 sps:$4 sm:$0xff]  }
  0x16   :  { %v3644_v8 = vld [vmem:[%s5465_s1 + $0x184] ss:$24 sps:$4 sm:$0xff]   ;;  %v3648_v10 = vld [vmem:[%s5465_s1 + $0x180] ss:$24 sps:$4 sm:$0xff]   ;;  %v3655_v12 = vld [vmem:[%s5465_s1 + $0x754] ss:$24 sps:$4 sm:$0xff]  }
  0x17   :  { %1806 = vmatpush1.bf16.msra.mxu0 %v3588_v22  ;;  %1827 = vmatprep.mubr.bf16.mxu0 %v4364_v62  ;;  %v3646_v9 = vld [vmem:[%s5465_s1 + $0x484] ss:$24 sps:$4 sm:$0xff]   ;;  %v3649_v11 = vld [vmem:[%s5465_s1 + $0x480] ss:$24 sps:$4 sm:$0xff]   ;;  %v3653_v14 = vld [vmem:[%s5465_s1 + $0x750] ss:$24 sps:$4 sm:$0xff]  }
  0x18   :  { %1847 = vmatpush1.bf16.msra.mxu1 %v3589_v23  ;;  %1807 = vmatprep.subr.bf16.mxu0 %v3590_v24  ;;  %v3658_v13 = vld [vmem:[%s5465_s1 + $0x15c] ss:$24 sps:$4 sm:$0xff]   ;;  %v3656_v15 = vld [vmem:[%s5465_s1 + $0x158] ss:$24 sps:$4 sm:$0xff]   ;;  %v3664_v17 = vld [vmem:[%s5465_s1 + $0x12c] ss:$24 sps:$4 sm:$0xff]  }
  0x19   :  { %1848 = vmatprep.subr.bf16.mxu1 %v3592_v25  ;;  %1868 = vmatprep.mubr.bf16.mxu1 %v4368_v63  ;;  %v3661_v16 = vld [vmem:[%s5465_s1 + $0x724] ss:$24 sps:$4 sm:$0xff]   ;;  %v3659_v18 = vld [vmem:[%s5465_s1 + $0x720] ss:$24 sps:$4 sm:$0xff]   ;;  %v3667_v20 = vld [vmem:[%s5465_s1 + $0x6f4] ss:$24 sps:$4 sm:$0xff]  }
  0x1a   :  { %v3662_v19 = vld [vmem:[%s5465_s1 + $0x128] ss:$24 sps:$4 sm:$0xff]   ;;  %v3670_v21 = vld [vmem:[%s5465_s1 + $0xfc] ss:$24 sps:$4 sm:$0xff]   ;;  %v3668_v23 = vld [vmem:[%s5465_s1 + $0xf8] ss:$24 sps:$4 sm:$0xff]  }
  0x1b   :  { %1808 = vmatpush1.bf16.msra.mxu0 %v3594_v26  ;;  %v3665_v22 = vld [vmem:[%s5465_s1 + $0x6f0] ss:$24 sps:$4 sm:$0xff]   ;;  %v3673_v24 = vld [vmem:[%s5465_s1 + $0x6c4] ss:$24 sps:$4 sm:$0xff]   ;;  %v3671_v26 = vld [vmem:[%s5465_s1 + $0x6c0] ss:$24 sps:$4 sm:$0xff]  }
  0x1c   :  { %1849 = vmatpush1.bf16.msra.mxu1 %v3595_v27  ;;  %1809 = vmatprep.subr.bf16.mxu0 %v3596_v28  ;;  %v3676_v25 = vld [vmem:[%s5465_s1 + $0xcc] ss:$24 sps:$4 sm:$0xff]   ;;  %v3674_v27 = vld [vmem:[%s5465_s1 + $0xc8] ss:$24 sps:$4 sm:$0xff]   ;;  %v3692_v40 = vld [vmem:[%s5465_s1 + $0x38] ss:$24 sps:$4 sm:$0xff]  }
  0x1d   :  { %1850 = vmatprep.subr.bf16.mxu1 %v3598_v29  ;;  %v3679_v28 = vld [vmem:[%s5465_s1 + $0x694] ss:$24 sps:$4 sm:$0xff]   ;;  %v3689_v38 = vld [vmem:[%s5465_s1 + $0x630] ss:$24 sps:$4 sm:$0xff]   ;;  %v3707_v55 = vld [vmem:[%s5465_s1 + $0x8a0] ss:$24 sps:$4 sm:$0xff]  }
  0x1e   :  { %v3682_v29 = vld [vmem:[%s5465_s1 + $0x9c] ss:$24 sps:$4 sm:$0xff]   ;;  %v3712_v54 = vld [vmem:[%s5465_s1 + $0x2ac] ss:$24 sps:$4 sm:$0xff]  }
  0x1f   :  { %1810 = vmatpush1.bf16.msra.mxu0 %v3600_v30  ;;  %v3677_v30 = vld [vmem:[%s5465_s1 + $0x690] ss:$24 sps:$4 sm:$0xff]  }
  0x20   :  { %1851 = vmatpush1.bf16.msra.mxu1 %v3601_v31  ;;  %1811 = vmatprep.subr.bf16.mxu0 %v3602_v32  ;;  %v3680_v31 = vld [vmem:[%s5465_s1 + $0x98] ss:$24 sps:$4 sm:$0xff]   ;;  %v3685_v32 = vld [vmem:[%s5465_s1 + $0x664] ss:$24 sps:$4 sm:$0xff]   ;;  %v3749_v39 = vld [vmem:[%s5464_s0 + $0x8] ss:$12 sps:$4 sm:$0xff]  }
  0x21   :  { %1852 = vmatprep.subr.bf16.mxu1 %v3604_v33  ;;  %v3688_v33 = vld [vmem:[%s5465_s1 + $0x6c] ss:$24 sps:$4 sm:$0xff]  }
  0x23   :  { %1812 = vmatpush2.bf16.msra.mxu0 %v3606_v34  ;;  %v3683_v34 = vld [vmem:[%s5465_s1 + $0x660] ss:$24 sps:$4 sm:$0xff]  }
  0x24   :  { %1853 = vmatpush2.bf16.msra.mxu1 %v3607_v35  ;;  %1813 = vmatprep.subr.bf16.mxu0 %v3608_v36  ;;  %v3686_v35 = vld [vmem:[%s5465_s1 + $0x68] ss:$24 sps:$4 sm:$0xff]   ;;  %v3691_v36 = vld [vmem:[%s5465_s1 + $0x634] ss:$24 sps:$4 sm:$0xff]  }
  0x25   :  { %1854 = vmatprep.subr.bf16.mxu1 %v3610_v37  ;;  %v3694_v37 = vld [vmem:[%s5465_s1 + $0x3c] ss:$24 sps:$4 sm:$0xff]  }
  0x27   :  { %1814 = vmatpush2.bf16.msra.mxu0 %v3612_v41  ;;  %v3697_v41 = vld [vmem:[%s5465_s1 + $0x604] ss:$24 sps:$4 sm:$0xff]  }
  0x28   :  { %1855 = vmatpush2.bf16.msra.mxu1 %v3613_v42  ;;  %1815 = vmatprep.subr.bf16.mxu0 %v3614_v43  ;;  %v3700_v42 = vld [vmem:[%s5465_s1 + $0xc] ss:$24 sps:$4 sm:$0xff]   ;;  %v4505_v43 = vrot.slane %v3749_v39, %v4330_v51  ;;  %v3774_v39 = vld [vmem:[%s5465_s1 + $0x398] ss:$24 sps:$4 sm:$0xff]  }
  0x29   :  { %1856 = vmatprep.subr.bf16.mxu1 %v3616_v44  ;;  %v3695_v44 = vld [vmem:[%s5465_s1 + $0x600] ss:$24 sps:$4 sm:$0xff]  }
  0x2a   :  { %v4512_v45 = vcombine.high %v4505_v43, %v4505_v43 }
  0x2b   :  { %1816 = vmatpush2.bf16.msra.mxu0 %v3618_v47  ;;  %v3698_v47 = vld [vmem:[%s5465_s1 + $0x8] ss:$24 sps:$4 sm:$0xff]  }
  0x2c   :  { %1857 = vmatpush2.bf16.msra.mxu1 %v3619_v48  ;;  %1817 = vmatprep.subr.bf16.mxu0 %v3620_v49  ;;  %v3703_v48 = vld [vmem:[%s5465_s1 + $0x8d4] ss:$24 sps:$4 sm:$0xff]  }
  0x2d   :  { %1858 = vmatprep.subr.bf16.mxu1 %v3622_v50  ;;  %v3706_v49 = vld [vmem:[%s5465_s1 + $0x2dc] ss:$24 sps:$4 sm:$0xff]   ;;  %v3701_v50 = vld [vmem:[%s5465_s1 + $0x8d0] ss:$24 sps:$4 sm:$0xff]  }
  0x2f   :  { %1818 = vmatpush2.bf16.msra.mxu0 %v3624_v52  ;;  %v3704_v52 = vld [vmem:[%s5465_s1 + $0x2d8] ss:$24 sps:$4 sm:$0xff]  }
  0x30   :  { %1859 = vmatpush2.bf16.msra.mxu1 %v3625_v53  ;;  %1819 = vmatprep.subr.bf16.mxu0 %v3626_v56  ;;  %v3709_v53 = vld [vmem:[%s5465_s1 + $0x8a4] ss:$24 sps:$4 sm:$0xff]   ;;  %v3710_v56 = vld [vmem:[%s5465_s1 + $0x2a8] ss:$24 sps:$4 sm:$0xff]  }
  0x31   :  { %1860 = vmatprep.subr.bf16.mxu1 %v3628_v57  ;;  %v3715_v57 = vld [vmem:[%s5465_s1 + $0x874] ss:$24 sps:$4 sm:$0xff]  }
  0x33   :  { %1820 = vmatpush2.bf16.msra.mxu0 %v3630_v60  ;;  %v3718_v60 = vld [vmem:[%s5465_s1 + $0x27c] ss:$24 sps:$4 sm:$0xff]  }
  0x34   :  { %1861 = vmatpush2.bf16.msra.mxu1 %v3631_v61  ;;  %1821 = vmatprep.subr.bf16.mxu0 %v3632_v0  ;;  %v3713_v61 = vld [vmem:[%s5465_s1 + $0x870] ss:$24 sps:$4 sm:$0xff]  }
  0x35   :  { %1862 = vmatprep.subr.bf16.mxu1 %v3634_v1  ;;  %v3716_v0 = vld [vmem:[%s5465_s1 + $0x278] ss:$24 sps:$4 sm:$0xff]   ;;  %v3721_v1 = vld [vmem:[%s5465_s1 + $0x844] ss:$24 sps:$4 sm:$0xff]  }
  0x37   :  { %1822 = vmatpush2.bf16.msra.mxu0 %v3636_v2  ;;  %v3724_v2 = vld [vmem:[%s5465_s1 + $0x24c] ss:$24 sps:$4 sm:$0xff]  }
  0x38   :  { %1863 = vmatpush2.bf16.msra.mxu1 %v3637_v3  ;;  %1823 = vmatprep.subr.bf16.mxu0 %v3638_v4  ;;  %v3719_v3 = vld [vmem:[%s5465_s1 + $0x840] ss:$24 sps:$4 sm:$0xff]  }
  0x39   :  { %1864 = vmatprep.subr.bf16.mxu1 %v3640_v5  ;;  %v3722_v4 = vld [vmem:[%s5465_s1 + $0x248] ss:$24 sps:$4 sm:$0xff]   ;;  %v3727_v5 = vld [vmem:[%s5465_s1 + $0x814] ss:$24 sps:$4 sm:$0xff]  }
  0x3b   :  { %1824 = vmatpush2.bf16.msra.mxu0 %v3642_v6  ;;  %v3730_v6 = vld [vmem:[%s5465_s1 + $0x21c] ss:$24 sps:$4 sm:$0xff]  }
  0x3c   :  { %1865 = vmatpush2.bf16.msra.mxu1 %v3643_v7  ;;  %1825 = vmatprep.subr.bf16.mxu0 %v3644_v8  ;;  %v3725_v7 = vld [vmem:[%s5465_s1 + $0x810] ss:$24 sps:$4 sm:$0xff]  }
  0x3d   :  { %1866 = vmatprep.subr.bf16.mxu1 %v3646_v9  ;;  %v3728_v8 = vld [vmem:[%s5465_s1 + $0x218] ss:$24 sps:$4 sm:$0xff]   ;;  %v3733_v9 = vld [vmem:[%s5465_s1 + $0x7e4] ss:$24 sps:$4 sm:$0xff]  }
  0x3f   :  { %1826 = vmatpush2.bf16.msra.mxu0 %v3648_v10  ;;  %v3736_v10 = vld [vmem:[%s5465_s1 + $0x1ec] ss:$24 sps:$4 sm:$0xff]  }
  0x40   :  { %1867 = vmatpush2.bf16.msra.mxu1 %v3649_v11  ;;  %1877 = vmatprep.subr.bf16.mxu0 %v3655_v12  ;;  %v3731_v11 = vld [vmem:[%s5465_s1 + $0x7e0] ss:$24 sps:$4 sm:$0xff]  }
  0x41   :  { %1918 = vmatprep.subr.bf16.mxu1 %v3658_v13  ;;  %v3734_v12 = vld [vmem:[%s5465_s1 + $0x1e8] ss:$24 sps:$4 sm:$0xff]   ;;  %v3739_v13 = vld [vmem:[%s5465_s1 + $0x7b4] ss:$24 sps:$4 sm:$0xff]  }
  0x42   :  { %1828 = vmatmul.mubr.bf16.vlgmr.msra.gmra.mxu0 %v4351_v58 }
  0x43   :  { %1869 = vmatmul.mubr.bf16.vlgmr.msra.gmra.mxu1 %v4354_v59  ;;  %1878 = vmatpush1.bf16.msra.mxu0 %v3653_v14  ;;  %v3742_v14 = vld [vmem:[%s5465_s1 + $0x1bc] ss:$24 sps:$4 sm:$0xff]  }
  0x44   :  { %1919 = vmatpush1.bf16.msra.mxu1 %v3656_v15  ;;  %1879 = vmatprep.subr.bf16.mxu0 %v3661_v16  ;;  %v3737_v15 = vld [vmem:[%s5465_s1 + $0x7b0] ss:$24 sps:$4 sm:$0xff]  }
  0x45   :  { %1920 = vmatprep.subr.bf16.mxu1 %v3664_v17  ;;  %1950 = vmatprep.mubr.bf16.mxu1 %v4364_v62  ;;  %v3740_v16 = vld [vmem:[%s5465_s1 + $0x1b8] ss:$24 sps:$4 sm:$0xff]   ;;  %v3745_v17 = vld [vmem:[%s5465_s1 + $0x784] ss:$24 sps:$4 sm:$0xff]  }
  0x46   :  { %1909 = vmatprep.mubr.bf16.mxu0 %v4512_v45 }
  0x47   :  { %1880 = vmatpush1.bf16.msra.mxu0 %v3659_v18  ;;  %v3748_v18 = vld [vmem:[%s5465_s1 + $0x18c] ss:$24 sps:$4 sm:$0xff]  }
  0x48   :  { %1921 = vmatpush1.bf16.msra.mxu1 %v3662_v19  ;;  %1881 = vmatprep.subr.bf16.mxu0 %v3667_v20  ;;  %v3743_v19 = vld [vmem:[%s5465_s1 + $0x780] ss:$24 sps:$4 sm:$0xff]  }
  0x49   :  { %1922 = vmatprep.subr.bf16.mxu1 %v3670_v21  ;;  %v3746_v20 = vld [vmem:[%s5465_s1 + $0x188] ss:$24 sps:$4 sm:$0xff]   ;;  %v3752_v21 = vld [vmem:[%s5465_s1 + $0x45c] ss:$24 sps:$4 sm:$0xff]  }
  0x4b   :  { %1882 = vmatpush1.bf16.msra.mxu0 %v3665_v22  ;;  %v3755_v22 = vld [vmem:[%s5465_s1 + $0x75c] ss:$24 sps:$4 sm:$0xff]  }
  0x4c   :  { %1923 = vmatpush1.bf16.msra.mxu1 %v3668_v23  ;;  %1883 = vmatprep.subr.bf16.mxu0 %v3673_v24  ;;  %v3750_v23 = vld [vmem:[%s5465_s1 + $0x458] ss:$24 sps:$4 sm:$0xff]  }
  0x4d   :  { %1924 = vmatprep.subr.bf16.mxu1 %v3676_v25  ;;  %v3753_v24 = vld [vmem:[%s5465_s1 + $0x758] ss:$24 sps:$4 sm:$0xff]   ;;  %v3758_v25 = vld [vmem:[%s5465_s1 + $0x42c] ss:$24 sps:$4 sm:$0xff]  }
  0x4f   :  { %1884 = vmatpush1.bf16.msra.mxu0 %v3671_v26  ;;  %v3761_v26 = vld [vmem:[%s5465_s1 + $0x72c] ss:$24 sps:$4 sm:$0xff]  }
  0x50   :  { %1925 = vmatpush1.bf16.msra.mxu1 %v3674_v27  ;;  %1885 = vmatprep.subr.bf16.mxu0 %v3679_v28  ;;  %v3756_v27 = vld [vmem:[%s5465_s1 + $0x428] ss:$24 sps:$4 sm:$0xff]  }
  0x51   :  { %1926 = vmatprep.subr.bf16.mxu1 %v3682_v29  ;;  %v3759_v28 = vld [vmem:[%s5465_s1 + $0x728] ss:$24 sps:$4 sm:$0xff]   ;;  %v3764_v29 = vld [vmem:[%s5465_s1 + $0x3fc] ss:$24 sps:$4 sm:$0xff]  }
  0x53   :  { %1886 = vmatpush1.bf16.msra.mxu0 %v3677_v30  ;;  %v3767_v30 = vld [vmem:[%s5465_s1 + $0x6fc] ss:$24 sps:$4 sm:$0xff]  }
  0x54   :  { %1927 = vmatpush1.bf16.msra.mxu1 %v3680_v31  ;;  %1887 = vmatprep.subr.bf16.mxu0 %v3685_v32  ;;  %v3762_v31 = vld [vmem:[%s5465_s1 + $0x3f8] ss:$24 sps:$4 sm:$0xff]  }
  0x55   :  { %1928 = vmatprep.subr.bf16.mxu1 %v3688_v33  ;;  %v3765_v32 = vld [vmem:[%s5465_s1 + $0x6f8] ss:$24 sps:$4 sm:$0xff]   ;;  %v3770_v33 = vld [vmem:[%s5465_s1 + $0x3cc] ss:$24 sps:$4 sm:$0xff]  }
  0x57   :  { %1888 = vmatpush1.bf16.msra.mxu0 %v3683_v34  ;;  %v3773_v34 = vld [vmem:[%s5465_s1 + $0x6cc] ss:$24 sps:$4 sm:$0xff]  }
  0x58   :  { %1929 = vmatpush1.bf16.msra.mxu1 %v3686_v35  ;;  %1889 = vmatprep.subr.bf16.mxu0 %v3691_v36  ;;  %v3768_v35 = vld [vmem:[%s5465_s1 + $0x3c8] ss:$24 sps:$4 sm:$0xff]  }
  0x59   :  { %1930 = vmatprep.subr.bf16.mxu1 %v3694_v37  ;;  %v3771_v36 = vld [vmem:[%s5465_s1 + $0x6c8] ss:$24 sps:$4 sm:$0xff]   ;;  %v3776_v37 = vld [vmem:[%s5465_s1 + $0x39c] ss:$24 sps:$4 sm:$0xff]  }
  0x5b   :  { %1890 = vmatpush1.bf16.msra.mxu0 %v3689_v38  ;;  %v3779_v38 = vld [vmem:[%s5465_s1 + $0x69c] ss:$24 sps:$4 sm:$0xff]  }
  0x5c   :  { %1931 = vmatpush1.bf16.msra.mxu1 %v3692_v40  ;;  %1891 = vmatprep.subr.bf16.mxu0 %v3697_v41  ;;  %v3777_v40 = vld [vmem:[%s5465_s1 + $0x698] ss:$24 sps:$4 sm:$0xff]   ;;  %v3782_v41 = vld [vmem:[%s5465_s1 + $0x36c] ss:$24 sps:$4 sm:$0xff]  }
  0x5d   :  { %1932 = vmatprep.subr.bf16.mxu1 %v3700_v42  ;;  %v3785_v42 = vld [vmem:[%s5465_s1 + $0x66c] ss:$24 sps:$4 sm:$0xff]  }
  0x5f   :  { %1892 = vmatpush1.bf16.msra.mxu0 %v3695_v44  ;;  %v3780_v44 = vld [vmem:[%s5465_s1 + $0x368] ss:$24 sps:$4 sm:$0xff]  }
  0x60   :  { %1933 = vmatpush1.bf16.msra.mxu1 %v3698_v47  ;;  %1893 = vmatprep.subr.bf16.mxu0 %v3703_v48  ;;  %v3783_v47 = vld [vmem:[%s5465_s1 + $0x668] ss:$24 sps:$4 sm:$0xff]   ;;  %v3788_v48 = vld [vmem:[%s5465_s1 + $0x33c] ss:$24 sps:$4 sm:$0xff]  }
  0x61   :  { %1934 = vmatprep.subr.bf16.mxu1 %v3706_v49  ;;  %v3791_v49 = vld [vmem:[%s5465_s1 + $0x63c] ss:$24 sps:$4 sm:$0xff]  }
  0x63   :  { %1894 = vmatpush2.bf16.msra.mxu0 %v3701_v50  ;;  %v3786_v50 = vld [vmem:[%s5465_s1 + $0x338] ss:$24 sps:$4 sm:$0xff]  }
  0x64   :  { %1935 = vmatpush2.bf16.msra.mxu1 %v3704_v52  ;;  %1895 = vmatprep.subr.bf16.mxu0 %v3709_v53  ;;  %v3789_v52 = vld [vmem:[%s5465_s1 + $0x638] ss:$24 sps:$4 sm:$0xff]   ;;  %v3794_v53 = vld [vmem:[%s5465_s1 + $0x30c] ss:$24 sps:$4 sm:$0xff]  }
  0x65   :  { %1936 = vmatprep.subr.bf16.mxu1 %v3712_v54  ;;  %v3797_v54 = vld [vmem:[%s5465_s1 + $0x60c] ss:$24 sps:$4 sm:$0xff]  }
  0x67   :  { %1896 = vmatpush2.bf16.msra.mxu0 %v3707_v55  ;;  %v3792_v55 = vld [vmem:[%s5465_s1 + $0x308] ss:$24 sps:$4 sm:$0xff]  }
  0x68   :  { %1937 = vmatpush2.bf16.msra.mxu1 %v3710_v56  ;;  %1897 = vmatprep.subr.bf16.mxu0 %v3715_v57  ;;  %v3795_v56 = vld [vmem:[%s5465_s1 + $0x608] ss:$24 sps:$4 sm:$0xff]   ;;  %v3800_v57 = vld [vmem:[%s5465_s1 + $0x5dc] ss:$24 sps:$4 sm:$0xff]  }
  0x69   :  { %1938 = vmatprep.subr.bf16.mxu1 %v3718_v60  ;;  %v3803_v60 = vld [vmem:[%s5465_s1 + $0x8dc] ss:$24 sps:$4 sm:$0xff]  }
  0x6b   :  { %1898 = vmatpush2.bf16.msra.mxu0 %v3713_v61  ;;  %v3798_v61 = vld [vmem:[%s5465_s1 + $0x5d8] ss:$24 sps:$4 sm:$0xff]  }
  0x6c   :  { %1939 = vmatpush2.bf16.msra.mxu1 %v3716_v0  ;;  %1899 = vmatprep.subr.bf16.mxu0 %v3721_v1  ;;  %v3801_v0 = vld [vmem:[%s5465_s1 + $0x8d8] ss:$24 sps:$4 sm:$0xff]   ;;  %v3806_v1 = vld [vmem:[%s5465_s1 + $0x5ac] ss:$24 sps:$4 sm:$0xff]  }
  0x6d   :  { %1940 = vmatprep.subr.bf16.mxu1 %v3724_v2  ;;  %v3809_v2 = vld [vmem:[%s5465_s1 + $0x8ac] ss:$24 sps:$4 sm:$0xff]  }
  0x6f   :  { %1900 = vmatpush2.bf16.msra.mxu0 %v3719_v3  ;;  %v3804_v3 = vld [vmem:[%s5465_s1 + $0x5a8] ss:$24 sps:$4 sm:$0xff]  }
  0x70   :  { %1941 = vmatpush2.bf16.msra.mxu1 %v3722_v4  ;;  %1901 = vmatprep.subr.bf16.mxu0 %v3727_v5  ;;  %v3807_v4 = vld [vmem:[%s5465_s1 + $0x8a8] ss:$24 sps:$4 sm:$0xff]   ;;  %v3812_v5 = vld [vmem:[%s5465_s1 + $0x57c] ss:$24 sps:$4 sm:$0xff]  }
  0x71   :  { %1942 = vmatprep.subr.bf16.mxu1 %v3730_v6  ;;  %v3815_v6 = vld [vmem:[%s5465_s1 + $0x87c] ss:$24 sps:$4 sm:$0xff]  }
  0x73   :  { %1902 = vmatpush2.bf16.msra.mxu0 %v3725_v7  ;;  %v3810_v7 = vld [vmem:[%s5465_s1 + $0x578] ss:$24 sps:$4 sm:$0xff]  }
  0x74   :  { %1943 = vmatpush2.bf16.msra.mxu1 %v3728_v8  ;;  %1903 = vmatprep.subr.bf16.mxu0 %v3733_v9  ;;  %v3813_v8 = vld [vmem:[%s5465_s1 + $0x878] ss:$24 sps:$4 sm:$0xff]   ;;  %v3818_v9 = vld [vmem:[%s5465_s1 + $0x54c] ss:$24 sps:$4 sm:$0xff]  }
  0x75   :  { %1944 = vmatprep.subr.bf16.mxu1 %v3736_v10  ;;  %v3821_v10 = vld [vmem:[%s5465_s1 + $0x84c] ss:$24 sps:$4 sm:$0xff]  }
  0x77   :  { %1904 = vmatpush2.bf16.msra.mxu0 %v3731_v11  ;;  %v3816_v11 = vld [vmem:[%s5465_s1 + $0x548] ss:$24 sps:$4 sm:$0xff]  }
  0x78   :  { %1945 = vmatpush2.bf16.msra.mxu1 %v3734_v12  ;;  %1905 = vmatprep.subr.bf16.mxu0 %v3739_v13  ;;  %v3819_v12 = vld [vmem:[%s5465_s1 + $0x848] ss:$24 sps:$4 sm:$0xff]   ;;  %v3824_v13 = vld [vmem:[%s5465_s1 + $0x51c] ss:$24 sps:$4 sm:$0xff]  }
  0x79   :  { %1946 = vmatprep.subr.bf16.mxu1 %v3742_v14  ;;  %v3827_v14 = vld [vmem:[%s5465_s1 + $0x81c] ss:$24 sps:$4 sm:$0xff]  }
  0x7b   :  { %1906 = vmatpush2.bf16.msra.mxu0 %v3737_v15  ;;  %v3822_v15 = vld [vmem:[%s5465_s1 + $0x518] ss:$24 sps:$4 sm:$0xff]  }
  0x7c   :  { %1947 = vmatpush2.bf16.msra.mxu1 %v3740_v16  ;;  %1907 = vmatprep.subr.bf16.mxu0 %v3745_v17  ;;  %v3825_v16 = vld [vmem:[%s5465_s1 + $0x818] ss:$24 sps:$4 sm:$0xff]   ;;  %v3830_v17 = vld [vmem:[%s5465_s1 + $0x4ec] ss:$24 sps:$4 sm:$0xff]  }
  0x7d   :  { %1948 = vmatprep.subr.bf16.mxu1 %v3748_v18  ;;  %v3833_v18 = vld [vmem:[%s5465_s1 + $0x7ec] ss:$24 sps:$4 sm:$0xff]  }
  0x7f   :  { %1908 = vmatpush2.bf16.msra.mxu0 %v3743_v19  ;;  %v3828_v19 = vld [vmem:[%s5465_s1 + $0x4e8] ss:$24 sps:$4 sm:$0xff]  }
  0x80   :  { %1949 = vmatpush2.bf16.msra.mxu1 %v3746_v20  ;;  %1959 = vmatprep.subr.bf16.mxu0 %v3752_v21  ;;  %v3831_v20 = vld [vmem:[%s5465_s1 + $0x7e8] ss:$24 sps:$4 sm:$0xff]   ;;  %v3836_v21 = vld [vmem:[%s5465_s1 + $0x4bc] ss:$24 sps:$4 sm:$0xff]  }
  0x81   :  { %2000 = vmatprep.subr.bf16.mxu1 %v3755_v22  ;;  %v3839_v22 = vld [vmem:[%s5465_s1 + $0x7bc] ss:$24 sps:$4 sm:$0xff]  }
  0x82   :  { %1910 = vmatmul.mubr.bf16.vlgmr.msra.gmra.mxu0 %v4505_v43 }
  0x83   :  { %1951 = vmatmul.mubr.bf16.vlgmr.msra.gmra.mxu1 %v4351_v58  ;;  %1960 = vmatpush1.bf16.msra.mxu0 %v3750_v23  ;;  %v3834_v23 = vld [vmem:[%s5465_s1 + $0x4b8] ss:$24 sps:$4 sm:$0xff]  }
  0x84   :  { %2001 = vmatpush1.bf16.msra.mxu1 %v3753_v24  ;;  %1961 = vmatprep.subr.bf16.mxu0 %v3758_v25  ;;  %v3837_v24 = vld [vmem:[%s5465_s1 + $0x7b8] ss:$24 sps:$4 sm:$0xff]   ;;  %v3842_v25 = vld [vmem:[%s5465_s1 + $0x48c] ss:$24 sps:$4 sm:$0xff]  }
  0x85   :  { %2002 = vmatprep.subr.bf16.mxu1 %v3761_v26  ;;  %1991 = vmatprep.mubr.bf16.mxu0 %v4368_v63  ;;  %v3845_v26 = vld [vmem:[%s5465_s1 + $0x78c] ss:$24 sps:$4 sm:$0xff]  }
  0x86   :  { %2032 = vmatprep.mubr.bf16.mxu1 %v4512_v45 }
  0x87   :  { %1962 = vmatpush1.bf16.msra.mxu0 %v3756_v27  ;;  %v3840_v27 = vld [vmem:[%s5465_s1 + $0x488] ss:$24 sps:$4 sm:$0xff]  }
  0x88   :  { %2003 = vmatpush1.bf16.msra.mxu1 %v3759_v28  ;;  %1963 = vmatprep.subr.bf16.mxu0 %v3764_v29  ;;  %v3843_v28 = vld [vmem:[%s5465_s1 + $0x788] ss:$24 sps:$4 sm:$0xff]   ;;  %v3848_v29 = vld [vmem:[%s5465_s1 + $0x164] ss:$24 sps:$4 sm:$0xff]  }
  0x89   :  { %2004 = vmatprep.subr.bf16.mxu1 %v3767_v30  ;;  %v3851_v30 = vld [vmem:[%s5465_s1 + $0x464] ss:$24 sps:$4 sm:$0xff]  }
  0x8b   :  { %1964 = vmatpush1.bf16.msra.mxu0 %v3762_v31  ;;  %v3846_v31 = vld [vmem:[%s5465_s1 + $0x160] ss:$24 sps:$4 sm:$0xff]  }
  0x8c   :  { %2005 = vmatpush1.bf16.msra.mxu1 %v3765_v32  ;;  %1965 = vmatprep.subr.bf16.mxu0 %v3770_v33  ;;  %v3849_v32 = vld [vmem:[%s5465_s1 + $0x460] ss:$24 sps:$4 sm:$0xff]   ;;  %v3854_v33 = vld [vmem:[%s5465_s1 + $0x134] ss:$24 sps:$4 sm:$0xff]  }
  0x8d   :  { %2006 = vmatprep.subr.bf16.mxu1 %v3773_v34  ;;  %v3857_v34 = vld [vmem:[%s5465_s1 + $0x434] ss:$24 sps:$4 sm:$0xff]  }
  0x8f   :  { %1966 = vmatpush1.bf16.msra.mxu0 %v3768_v35  ;;  %v3852_v35 = vld [vmem:[%s5465_s1 + $0x130] ss:$24 sps:$4 sm:$0xff]  }
  0x90   :  { %2007 = vmatpush1.bf16.msra.mxu1 %v3771_v36  ;;  %1967 = vmatprep.subr.bf16.mxu0 %v3776_v37  ;;  %v3855_v36 = vld [vmem:[%s5465_s1 + $0x430] ss:$24 sps:$4 sm:$0xff]   ;;  %v3860_v37 = vld [vmem:[%s5465_s1 + $0x104] ss:$24 sps:$4 sm:$0xff]  }
  0x91   :  { %2008 = vmatprep.subr.bf16.mxu1 %v3779_v38  ;;  %v3863_v38 = vld [vmem:[%s5465_s1 + $0x404] ss:$24 sps:$4 sm:$0xff]  }
  0x93   :  { %1968 = vmatpush1.bf16.msra.mxu0 %v3774_v39  ;;  %v3858_v39 = vld [vmem:[%s5465_s1 + $0x100] ss:$24 sps:$4 sm:$0xff]  }
  0x94   :  { %2009 = vmatpush1.bf16.msra.mxu1 %v3777_v40  ;;  %1969 = vmatprep.subr.bf16.mxu0 %v3782_v41  ;;  %v3861_v40 = vld [vmem:[%s5465_s1 + $0x400] ss:$24 sps:$4 sm:$0xff]   ;;  %v3866_v41 = vld [vmem:[%s5465_s1 + $0xd4] ss:$24 sps:$4 sm:$0xff]  }
  0x95   :  { %2010 = vmatprep.subr.bf16.mxu1 %v3785_v42  ;;  %v3869_v42 = vld [vmem:[%s5465_s1 + $0x3d4] ss:$24 sps:$4 sm:$0xff]  }
  0x97   :  { %1970 = vmatpush1.bf16.msra.mxu0 %v3780_v44  ;;  %v3864_v44 = vld [vmem:[%s5465_s1 + $0xd0] ss:$24 sps:$4 sm:$0xff]  }
  0x98   :  { %2011 = vmatpush1.bf16.msra.mxu1 %v3783_v47  ;;  %1971 = vmatprep.subr.bf16.mxu0 %v3788_v48  ;;  %v3875_v47 = vld [vmem:[%s5465_s1 + $0x3a4] ss:$24 sps:$4 sm:$0xff]   ;;  %v3870_v48 = vld [vmem:[%s5465_s1 + $0xa0] ss:$24 sps:$4 sm:$0xff]  }
  0x99   :  { %2012 = vmatprep.subr.bf16.mxu1 %v3791_v49  ;;  %v3873_v49 = vld [vmem:[%s5465_s1 + $0x3a0] ss:$24 sps:$4 sm:$0xff]  }
  0x9b   :  { %1972 = vmatpush1.bf16.msra.mxu0 %v3786_v50  ;;  %v3878_v50 = vld [vmem:[%s5465_s1 + $0x74] ss:$24 sps:$4 sm:$0xff]  }
  0x9c   :  { %2013 = vmatpush1.bf16.msra.mxu1 %v3789_v52  ;;  %1973 = vmatprep.subr.bf16.mxu0 %v3794_v53  ;;  %v3881_v52 = vld [vmem:[%s5465_s1 + $0x374] ss:$24 sps:$4 sm:$0xff]   ;;  %v3876_v53 = vld [vmem:[%s5465_s1 + $0x70] ss:$24 sps:$4 sm:$0xff]  }
  0x9d   :  { %2014 = vmatprep.subr.bf16.mxu1 %v3797_v54  ;;  %v3879_v54 = vld [vmem:[%s5465_s1 + $0x370] ss:$24 sps:$4 sm:$0xff]  }
  0x9f   :  { %1974 = vmatpush1.bf16.msra.mxu0 %v3792_v55  ;;  %v3884_v55 = vld [vmem:[%s5465_s1 + $0x44] ss:$24 sps:$4 sm:$0xff]  }
  0xa0   :  { %2015 = vmatpush1.bf16.msra.mxu1 %v3795_v56  ;;  %1975 = vmatprep.subr.bf16.mxu0 %v3800_v57  ;;  %v3887_v56 = vld [vmem:[%s5465_s1 + $0x344] ss:$24 sps:$4 sm:$0xff]   ;;  %v3882_v57 = vld [vmem:[%s5465_s1 + $0x40] ss:$24 sps:$4 sm:$0xff]  }
  0xa1   :  { %2016 = vmatprep.subr.bf16.mxu1 %v3803_v60  ;;  %v3885_v60 = vld [vmem:[%s5465_s1 + $0x340] ss:$24 sps:$4 sm:$0xff]  }
  0xa3   :  { %1976 = vmatpush2.bf16.msra.mxu0 %v3798_v61  ;;  %v3890_v61 = vld [vmem:[%s5465_s1 + $0x14] ss:$24 sps:$4 sm:$0xff]  }
  0xa4   :  { %2017 = vmatpush2.bf16.msra.mxu1 %v3801_v0  ;;  %1977 = vmatprep.subr.bf16.mxu0 %v3806_v1  ;;  %v3893_v0 = vld [vmem:[%s5465_s1 + $0x314] ss:$24 sps:$4 sm:$0xff]   ;;  %v3888_v1 = vld [vmem:[%s5465_s1 + $0x10] ss:$24 sps:$4 sm:$0xff]  }
  0xa5   :  { %2018 = vmatprep.subr.bf16.mxu1 %v3809_v2  ;;  %v3891_v2 = vld [vmem:[%s5465_s1 + $0x310] ss:$24 sps:$4 sm:$0xff]  }
  0xa7   :  { %1978 = vmatpush2.bf16.msra.mxu0 %v3804_v3  ;;  %v3896_v3 = vld [vmem:[%s5465_s1 + $0x2e4] ss:$24 sps:$4 sm:$0xff]  }
  0xa8   :  { %2019 = vmatpush2.bf16.msra.mxu1 %v3807_v4  ;;  %1979 = vmatprep.subr.bf16.mxu0 %v3812_v5  ;;  %v3899_v4 = vld [vmem:[%s5465_s1 + $0x5e4] ss:$24 sps:$4 sm:$0xff]   ;;  %v3894_v5 = vld [vmem:[%s5465_s1 + $0x2e0] ss:$24 sps:$4 sm:$0xff]  }
  0xa9   :  { %2020 = vmatprep.subr.bf16.mxu1 %v3815_v6  ;;  %v3897_v6 = vld [vmem:[%s5465_s1 + $0x5e0] ss:$24 sps:$4 sm:$0xff]  }
  0xab   :  { %1980 = vmatpush2.bf16.msra.mxu0 %v3810_v7  ;;  %v3902_v7 = vld [vmem:[%s5465_s1 + $0x2b4] ss:$24 sps:$4 sm:$0xff]  }
  0xac   :  { %2021 = vmatpush2.bf16.msra.mxu1 %v3813_v8  ;;  %1981 = vmatprep.subr.bf16.mxu0 %v3818_v9  ;;  %v3905_v8 = vld [vmem:[%s5465_s1 + $0x5b4] ss:$24 sps:$4 sm:$0xff]   ;;  %v3900_v9 = vld [vmem:[%s5465_s1 + $0x2b0] ss:$24 sps:$4 sm:$0xff]  }
  0xad   :  { %2022 = vmatprep.subr.bf16.mxu1 %v3821_v10  ;;  %v3903_v10 = vld [vmem:[%s5465_s1 + $0x5b0] ss:$24 sps:$4 sm:$0xff]  }
  0xaf   :  { %1982 = vmatpush2.bf16.msra.mxu0 %v3816_v11  ;;  %v3908_v11 = vld [vmem:[%s5465_s1 + $0x284] ss:$24 sps:$4 sm:$0xff]  }
  0xb0   :  { %2023 = vmatpush2.bf16.msra.mxu1 %v3819_v12  ;;  %1983 = vmatprep.subr.bf16.mxu0 %v3824_v13  ;;  %v3911_v12 = vld [vmem:[%s5465_s1 + $0x584] ss:$24 sps:$4 sm:$0xff]  }
  0xb1   :  { %2024 = vmatprep.subr.bf16.mxu1 %v3827_v14 }
  0xb3   :  { %1984 = vmatpush2.bf16.msra.mxu0 %v3822_v15 }
  0xb4   :  { %2025 = vmatpush2.bf16.msra.mxu1 %v3825_v16  ;;  %1985 = vmatprep.subr.bf16.mxu0 %v3830_v17 }
  0xb5   :  { %2026 = vmatprep.subr.bf16.mxu1 %v3833_v18 }
  0xb7   :  { %1986 = vmatpush2.bf16.msra.mxu0 %v3828_v19 }
  0xb8   :  { %2027 = vmatpush2.bf16.msra.mxu1 %v3831_v20  ;;  %1987 = vmatprep.subr.bf16.mxu0 %v3836_v21 }
  0xb9   :  { %2028 = vmatprep.subr.bf16.mxu1 %v3839_v22 }
  0xbb   :  { %1988 = vmatpush2.bf16.msra.mxu0 %v3834_v23 }
  0xbc   :  { %2029 = vmatpush2.bf16.msra.mxu1 %v3837_v24  ;;  %1989 = vmatprep.subr.bf16.mxu0 %v3842_v25 }
  0xbd   :  { %2030 = vmatprep.subr.bf16.mxu1 %v3845_v26 }
  0xbf   :  { %1990 = vmatpush2.bf16.msra.mxu0 %v3840_v27 }
  0xc0   :  { %2031 = vmatpush2.bf16.msra.mxu1 %v3843_v28  ;;  %2041 = vmatprep.subr.bf16.mxu0 %v3848_v29 }
  0xc1   :  { %2082 = vmatprep.subr.bf16.mxu1 %v3851_v30 }
  0xc2   :  { %1992 = vmatmul.mubr.bf16.vlgmr.msra.gmra.mxu0 %v4354_v59 }
  0xc3   :  { %2033 = vmatmul.mubr.bf16.vlgmr.msra.gmra.mxu1 %v4505_v43  ;;  %2042 = vmatpush1.bf16.msra.mxu0 %v3846_v31 }
  0xc4   :  { %2083 = vmatpush1.bf16.msra.mxu1 %v3849_v32  ;;  %2043 = vmatprep.subr.bf16.mxu0 %v3854_v33 }
  0xc5   :  { %2084 = vmatprep.subr.bf16.mxu1 %v3857_v34  ;;  %2073 = vmatprep.mubr.bf16.mxu0 %v4364_v62  ;;  %v3867_v62 = vld [vmem:[%s5465_s1 + $0x3d0] ss:$24 sps:$4 sm:$0xff]  }
  0xc6   :  { %2114 = vmatprep.mubr.bf16.mxu1 %v4368_v63  ;;  %v3872_v63 = vld [vmem:[%s5465_s1 + $0xa4] ss:$24 sps:$4 sm:$0xff]  }
  0xc7   :  { %2044 = vmatpush1.bf16.msra.mxu0 %v3852_v35 }
  0xc8   :  { %2085 = vmatpush1.bf16.msra.mxu1 %v3855_v36  ;;  %2045 = vmatprep.subr.bf16.mxu0 %v3860_v37 }
  0xc9   :  { %2086 = vmatprep.subr.bf16.mxu1 %v3863_v38 }
  0xcb   :  { %2046 = vmatpush1.bf16.msra.mxu0 %v3858_v39 }
  0xcc   :  { %2087 = vmatpush1.bf16.msra.mxu1 %v3861_v40  ;;  %2047 = vmatprep.subr.bf16.mxu0 %v3866_v41 }
  0xcd   :  { %2088 = vmatprep.subr.bf16.mxu1 %v3869_v42 }
  0xcf   :  { %2048 = vmatpush1.bf16.msra.mxu0 %v3864_v44 }
  0xd0   :  { %2089 = vmatpush1.bf16.msra.mxu1 %v3867_v62  ;;  %2049 = vmatprep.subr.bf16.mxu0 %v3872_v63 }
  0xd1   :  { %2090 = vmatprep.subr.bf16.mxu1 %v3875_v47 }
  0xd3   :  { %2050 = vmatpush1.bf16.msra.mxu0 %v3870_v48 }
  0xd4   :  { %2091 = vmatpush1.bf16.msra.mxu1 %v3873_v49  ;;  %2051 = vmatprep.subr.bf16.mxu0 %v3878_v50 }
  0xd5   :  { %2092 = vmatprep.subr.bf16.mxu1 %v3881_v52 }
  0xd7   :  { %2052 = vmatpush1.bf16.msra.mxu0 %v3876_v53 }
  0xd8   :  { %2093 = vmatpush1.bf16.msra.mxu1 %v3879_v54  ;;  %2053 = vmatprep.subr.bf16.mxu0 %v3884_v55 }
  0xd9   :  { %2094 = vmatprep.subr.bf16.mxu1 %v3887_v56 }
  0xdb   :  { %2054 = vmatpush1.bf16.msra.mxu0 %v3882_v57 }
  0xdc   :  { %2095 = vmatpush1.bf16.msra.mxu1 %v3885_v60  ;;  %2055 = vmatprep.subr.bf16.mxu0 %v3890_v61 }
  0xdd   :  { %2096 = vmatprep.subr.bf16.mxu1 %v3893_v0 }
  0xdf   :  { %2056 = vmatpush1.bf16.msra.mxu0 %v3888_v1 }
  0xe0   :  { %2097 = vmatpush1.bf16.msra.mxu1 %v3891_v2  ;;  %2057 = vmatprep.subr.bf16.mxu0 %v3896_v3 }
  0xe1   :  { %2098 = vmatprep.subr.bf16.mxu1 %v3899_v4 }
  0xe3   :  { %2058 = vmatpush2.bf16.msra.mxu0 %v3894_v5 }
  0xe4   :  { %2099 = vmatpush2.bf16.msra.mxu1 %v3897_v6  ;;  %2059 = vmatprep.subr.bf16.mxu0 %v3902_v7 }
  0xe5   :  { %2100 = vmatprep.subr.bf16.mxu1 %v3905_v8 }
  0xe6   :  { %11 = vsyncpa [#allocation4], 0  ;;  %v3906_v13 = vld [vmem:[%s5465_s1 + $0x280] ss:$24 sps:$4 sm:$0xff]   ;;  %v3914_v15 = vld [vmem:[%s5465_s1 + $0x254] ss:$24 sps:$4 sm:$0xff]  }
  0xe7   :  { %2060 = vmatpush2.bf16.msra.mxu0 %v3900_v9  ;;  %v3909_v14 = vld [vmem:[%s5465_s1 + $0x580] ss:$24 sps:$4 sm:$0xff]   ;;  %v3917_v16 = vld [vmem:[%s5465_s1 + $0x554] ss:$24 sps:$4 sm:$0xff]   ;;  %v3912_v17 = vld [vmem:[%s5465_s1 + $0x250] ss:$24 sps:$4 sm:$0xff]  }
  0xe8   :  { %2101 = vmatpush2.bf16.msra.mxu1 %v3903_v10  ;;  %2061 = vmatprep.subr.bf16.mxu0 %v3908_v11  ;;  %v3915_v18 = vld [vmem:[%s5465_s1 + $0x550] ss:$24 sps:$4 sm:$0xff]   ;;  %v3920_v19 = vld [vmem:[%s5465_s1 + $0x224] ss:$24 sps:$4 sm:$0xff]   ;;  %v3918_v21 = vld [vmem:[%s5465_s1 + $0x220] ss:$24 sps:$4 sm:$0xff]  }
  0xe9   :  { %2102 = vmatprep.subr.bf16.mxu1 %v3911_v12  ;;  %v3923_v20 = vld [vmem:[%s5465_s1 + $0x524] ss:$24 sps:$4 sm:$0xff]   ;;  %v3921_v22 = vld [vmem:[%s5465_s1 + $0x520] ss:$24 sps:$4 sm:$0xff]   ;;  %v3926_v23 = vld [vmem:[%s5465_s1 + $0x1f4] ss:$24 sps:$4 sm:$0xff]  }
  0xea   :  { %v3929_v24 = vld [vmem:[%s5465_s1 + $0x4f4] ss:$24 sps:$4 sm:$0xff]   ;;  %v3924_v25 = vld [vmem:[%s5465_s1 + $0x1f0] ss:$24 sps:$4 sm:$0xff]   ;;  %v3932_v27 = vld [vmem:[%s5465_s1 + $0x1c4] ss:$24 sps:$4 sm:$0xff]  }
  0xeb   :  { %2062 = vmatpush2.bf16.msra.mxu0 %v3906_v13  ;;  %v3927_v26 = vld [vmem:[%s5465_s1 + $0x4f0] ss:$24 sps:$4 sm:$0xff]   ;;  %v3935_v28 = vld [vmem:[%s5465_s1 + $0x4c4] ss:$24 sps:$4 sm:$0xff]   ;;  %v3930_v29 = vld [vmem:[%s5465_s1 + $0x1c0] ss:$24 sps:$4 sm:$0xff]  }
  0xec   :  { %2103 = vmatpush2.bf16.msra.mxu1 %v3909_v14  ;;  %2063 = vmatprep.subr.bf16.mxu0 %v3914_v15  ;;  %v3933_v30 = vld [vmem:[%s5465_s1 + $0x4c0] ss:$24 sps:$4 sm:$0xff]   ;;  %v3938_v31 = vld [vmem:[%s5465_s1 + $0x194] ss:$24 sps:$4 sm:$0xff]   ;;  %v3936_v33 = vld [vmem:[%s5465_s1 + $0x190] ss:$24 sps:$4 sm:$0xff]  }
  0xed   :  { %2104 = vmatprep.subr.bf16.mxu1 %v3917_v16  ;;  %v3941_v32 = vld [vmem:[%s5465_s1 + $0x494] ss:$24 sps:$4 sm:$0xff]   ;;  %v3939_v34 = vld [vmem:[%s5465_s1 + $0x490] ss:$24 sps:$4 sm:$0xff]   ;;  %v3944_v35 = vld [vmem:[%s5465_s1 + $0x764] ss:$24 sps:$4 sm:$0xff]  }
  0xee   :  { %v3992_v36 = vld [vmem:[%s5466_s2 + $0x74] ss:$8 sps:$4 sm:$0xff]   ;;  %v3942_v37 = vld [vmem:[%s5465_s1 + $0x760] ss:$24 sps:$4 sm:$0xff]   ;;  %v3998_v40 = vld [vmem:[%s5466_s2 + $0x64] ss:$8 sps:$4 sm:$0xff]  }
  0xef   :  { %2064 = vmatpush2.bf16.msra.mxu0 %v3912_v17  ;;  %v3947_v38 = vld [vmem:[%s5465_s1 + $0x734] ss:$24 sps:$4 sm:$0xff]   ;;  %v3990_v39 = vld [vmem:[%s5466_s2 + $0x70] ss:$8 sps:$4 sm:$0xff]   ;;  %v3950_v48 = vld [vmem:[%s5465_s1 + $0x704] ss:$24 sps:$4 sm:$0xff]  }
  0xf0   :  { %2105 = vmatpush2.bf16.msra.mxu1 %v3915_v18  ;;  %2065 = vmatprep.subr.bf16.mxu0 %v3920_v19  ;;  %v3945_v62 = vld [vmem:[%s5465_s1 + $0x730] ss:$24 sps:$4 sm:$0xff]   ;;  %v4004_v49 = vld [vmem:[%s5466_s2 + $0x54] ss:$8 sps:$4 sm:$0xff]   ;;  %v3948_v52 = vld [vmem:[%s5465_s1 + $0x700] ss:$24 sps:$4 sm:$0xff]  }
  0xf1   :  { %2106 = vmatprep.subr.bf16.mxu1 %v3923_v20  ;;  %v4157_v53 = vmov 0.0   ;;  %v3953_v55 = vld [vmem:[%s5465_s1 + $0x6d4] ss:$24 sps:$4 sm:$0xff]   ;;  %v4002_v57 = vld [vmem:[%s5466_s2 + $0x50] ss:$8 sps:$4 sm:$0xff]   ;;  %vm2196_vm0 = vcmask 1043456  }
  0xf2   :  { %25 = vst [vmem:[#allocation2 + $0x8] sm:$0xf] %v4157_v53  ;;  %v4010_v60 = vld [vmem:[%s5466_s2 + $0x44] ss:$8 sps:$4 sm:$0xff]   ;;  %v3951_v61 = vld [vmem:[%s5465_s1 + $0x6d0] ss:$24 sps:$4 sm:$0xff]  }
  0xf3   :  { %2066 = vmatpush2.bf16.msra.mxu0 %v3918_v21  ;;  %v3956_v0 = vld [vmem:[%s5465_s1 + $0x6a4] ss:$24 sps:$4 sm:$0xff]   ;;  %v4008_v1 = vld [vmem:[%s5466_s2 + $0x40] ss:$8 sps:$4 sm:$0xff]   ;;  %v3959_v4 = vld [vmem:[%s5465_s1 + $0x674] ss:$24 sps:$4 sm:$0xff]  }
  0xf4   :  { %2107 = vmatpush2.bf16.msra.mxu1 %v3921_v22  ;;  %2067 = vmatprep.subr.bf16.mxu0 %v3926_v23  ;;  %v4016_v2 = vld [vmem:[%s5466_s2 + $0x34] ss:$8 sps:$4 sm:$0xff]   ;;  %v3954_v3 = vld [vmem:[%s5465_s1 + $0x6a0] ss:$24 sps:$4 sm:$0xff]   ;;  %v4022_v6 = vld [vmem:[%s5466_s2 + $0x24] ss:$8 sps:$4 sm:$0xff]  }
  0xf5   :  { %2108 = vmatprep.subr.bf16.mxu1 %v3929_v24  ;;  %v4014_v5 = vld [vmem:[%s5466_s2 + $0x30] ss:$8 sps:$4 sm:$0xff]   ;;  %v3962_v8 = vld [vmem:[%s5465_s1 + $0x644] ss:$24 sps:$4 sm:$0xff]   ;;  %v4020_v9 = vld [vmem:[%s5466_s2 + $0x20] ss:$8 sps:$4 sm:$0xff]  }
  0xf6   :  { %v3957_v7 = vld [vmem:[%s5465_s1 + $0x670] ss:$24 sps:$4 sm:$0xff]   ;;  %v4028_v10 = vld [vmem:[%s5466_s2 + $0x14] ss:$8 sps:$4 sm:$0xff]   ;;  %v3960_v11 = vld [vmem:[%s5465_s1 + $0x640] ss:$24 sps:$4 sm:$0xff]  }
  0xf7   :  { %2068 = vmatpush2.bf16.msra.mxu0 %v3924_v25  ;;  %v3965_v12 = vld [vmem:[%s5465_s1 + $0x614] ss:$24 sps:$4 sm:$0xff]   ;;  %v4026_v13 = vld [vmem:[%s5466_s2 + $0x10] ss:$8 sps:$4 sm:$0xff]   ;;  %v3968_v16 = vld [vmem:[%s5465_s1 + $0x8e4] ss:$24 sps:$4 sm:$0xff]  }
  0xf8   :  { %2109 = vmatpush2.bf16.msra.mxu1 %v3927_v26  ;;  %2069 = vmatprep.subr.bf16.mxu0 %v3932_v27  ;;  %v4034_v14 = vld [vmem:[%s5466_s2 + $0x4] ss:$8 sps:$4 sm:$0xff]   ;;  %v3963_v15 = vld [vmem:[%s5465_s1 + $0x610] ss:$24 sps:$4 sm:$0xff]   ;;  %v4040_v18 = vld [vmem:[%s5466_s2 + $0xf4] ss:$8 sps:$4 sm:$0xff]  }
  0xf9   :  { %2110 = vmatprep.subr.bf16.mxu1 %v3935_v28  ;;  %v4032_v17 = vld [vmem:[%s5466_s2] ss:$8 sps:$4 sm:$0xff]   ;;  %v3971_v20 = vld [vmem:[%s5465_s1 + $0x8b4] ss:$24 sps:$4 sm:$0xff]   ;;  %v4038_v21 = vld [vmem:[%s5466_s2 + $0xf0] ss:$8 sps:$4 sm:$0xff]  }
  0xfa   :  { %v3966_v19 = vld [vmem:[%s5465_s1 + $0x8e0] ss:$24 sps:$4 sm:$0xff]   ;;  %v4046_v22 = vld [vmem:[%s5466_s2 + $0xe4] ss:$8 sps:$4 sm:$0xff]   ;;  %v3969_v23 = vld [vmem:[%s5465_s1 + $0x8b0] ss:$24 sps:$4 sm:$0xff]  }
  0xfb   :  { %2070 = vmatpush2.bf16.msra.mxu0 %v3930_v29  ;;  %v3974_v24 = vld [vmem:[%s5465_s1 + $0x884] ss:$24 sps:$4 sm:$0xff]   ;;  %v4044_v25 = vld [vmem:[%s5466_s2 + $0xe0] ss:$8 sps:$4 sm:$0xff]   ;;  %v3977_v28 = vld [vmem:[%s5465_s1 + $0x854] ss:$24 sps:$4 sm:$0xff]  }
  0xfc   :  { %2111 = vmatpush2.bf16.msra.mxu1 %v3933_v30  ;;  %2071 = vmatprep.subr.bf16.mxu0 %v3938_v31  ;;  %v4052_v26 = vld [vmem:[%s5466_s2 + $0xd4] ss:$8 sps:$4 sm:$0xff]   ;;  %v3972_v27 = vld [vmem:[%s5465_s1 + $0x880] ss:$24 sps:$4 sm:$0xff]   ;;  %v4058_v30 = vld [vmem:[%s5466_s2 + $0xc4] ss:$8 sps:$4 sm:$0xff]  }
  0xfd   :  { %2112 = vmatprep.subr.bf16.mxu1 %v3941_v32  ;;  %v4050_v29 = vld [vmem:[%s5466_s2 + $0xd0] ss:$8 sps:$4 sm:$0xff]   ;;  %v3980_v32 = vld [vmem:[%s5465_s1 + $0x824] ss:$24 sps:$4 sm:$0xff]   ;;  %vm2348_vm1 = vcmask 1041409   ;;  %vm2350_vm2 = vcmask 1043459  }
  0xfe   :  { %v3975_v31 = vld [vmem:[%s5465_s1 + $0x850] ss:$24 sps:$4 sm:$0xff]   ;;  %vm2352_vm3 = vcmask 1045509   ;;  %vm2354_vm4 = vcmask 1047559   ;;  %s4158_s15 = smov [#allocation3]  }
  0xff   :  { %2072 = vmatpush2.bf16.msra.mxu0 %v3936_v33  ;;  %v4056_v33 = vld [vmem:[%s5466_s2 + $0xc0] ss:$8 sps:$4 sm:$0xff]   ;;  %s3150_s16 = sshll.u32 %s4158_s15, 4  ;;  %s3151_s16 = int_to_ptr.vmem [resolvable:$true] %s3150_s16 }
 0x100   :  { %2113 = vmatpush2.bf16.msra.mxu1 %v3939_v34  ;;  %2123 = vmatprep.subr.bf16.mxu0 %v3944_v35  ;;  %v4064_v34 = vld [vmem:[%s5466_s2 + $0xb4] ss:$8 sps:$4 sm:$0xff]   ;;  %v3978_v35 = vld [vmem:[%s5465_s1 + $0x820] ss:$24 sps:$4 sm:$0xff]   ;;  %p4139_p1 = scmp.lt.s32.totalorder %s3151_s16, %s3151_s16 }
 0x101   :  { %3007 = vmatprep.subr.bf16.mxu1 %v3992_v36  ;;  %v3983_v36 = vld [vmem:[%s5465_s1 + $0x7f4] ss:$24 sps:$4 sm:$0xff]  }
 0x102   :  { %v1829_v41 = vpop.f32.mrf.mxu0  ;;  %2074 = vmatmul.mubr.bf16.vlgmr.msra.gmra.mxu0 %v4351_v58  ;;  %v3996_v58 = vld [vmem:[%s5466_s2 + $0x60] ss:$8 sps:$4 sm:$0xff]  }
 0x103   :  { %v1870_v42 = vpop.f32.mrf.mxu1  ;;  %2115 = vmatmul.mubr.bf16.vlgmr.msra.gmra.mxu1 %v4354_v59  ;;  %2124 = vmatpush1.bf16.msra.mxu0 %v3942_v37  ;;  %v4062_v37 = vld [vmem:[%s5466_s2 + $0xb0] ss:$8 sps:$4 sm:$0xff]  }
 0x104   :  { %v5026_v44 = vadd.f32 %v1870_v42, %v1829_v41  ;;  %2155 = vmatprep.mubr.bf16.mxu0 %v4512_v45  ;;  %v1831_v63 = vpop.f32.mrf.mxu0  ;;  %2125 = vmatprep.subr.bf16.mxu0 %v3947_v38  ;;  %v4070_v38 = vld [vmem:[%s5466_s2 + $0xa4] ss:$8 sps:$4 sm:$0xff]   ;;  %v4068_v41 = vld [vmem:[%s5466_s2 + $0xa0] ss:$8 sps:$4 sm:$0xff]   ;;  %v4076_v42 = vld [vmem:[%s5466_s2 + $0x94] ss:$8 sps:$4 sm:$0xff]  }
 0x105   :  { %v1872_v47 = vpop.f32.mrf.mxu1  ;;  %3008 = vmatpush1.bf16.msra.mxu1 %v3990_v39  ;;  %v3981_v39 = vld [vmem:[%s5465_s1 + $0x7f0] ss:$24 sps:$4 sm:$0xff]  }
 0x106   :  { %v5038_v59 = vadd.f32 %v1872_v47, %v1831_v63  ;;  %3009 = vmatprep.subr.bf16.mxu1 %v3998_v40  ;;  %v1833_v45 = vpop.f32.mrf.mxu0  ;;  %v3986_v40 = vld [vmem:[%s5465_s1 + $0x7c4] ss:$24 sps:$4 sm:$0xff]   ;;  %v3989_v63 = vld [vmem:[%s5465_s1 + $0x794] ss:$24 sps:$4 sm:$0xff]   ;;  %v4074_v47 = vld [vmem:[%s5466_s2 + $0x90] ss:$8 sps:$4 sm:$0xff]  }
 0x107   :  { %v1874_v50 = vpop.f32.mrf.mxu1  ;;  %2126 = vmatpush1.bf16.msra.mxu0 %v3945_v62  ;;  %v3984_v62 = vld [vmem:[%s5465_s1 + $0x7c0] ss:$24 sps:$4 sm:$0xff]  }
 0x108   :  { %v1834_v54 = vpop.f32.mrf.mxu0  ;;  %2127 = vmatprep.subr.bf16.mxu0 %v3950_v48  ;;  %v4082_v48 = vld [vmem:[%s5466_s2 + $0x84] ss:$8 sps:$4 sm:$0xff]   ;;  %v4080_v45 = vld [vmem:[%s5466_s2 + $0x80] ss:$8 sps:$4 sm:$0xff]   ;;  %v3993_v50 = vld [vmem:[%s5466_s2 + $0x170] ss:$8 sps:$4 sm:$0xff]  }
 0x109   :  { %v1875_v56 = vpop.f32.mrf.mxu1  ;;  %3010 = vmatpush1.bf16.msra.mxu1 %v3996_v58  ;;  %v3987_v58 = vld [vmem:[%s5465_s1 + $0x790] ss:$24 sps:$4 sm:$0xff]  }
 0x10a   :  { %3011 = vmatprep.subr.bf16.mxu1 %v4004_v49  ;;  %v3995_v49 = vld [vmem:[%s5466_s2 + $0x174] ss:$8 sps:$4 sm:$0xff]   ;;  %v3999_v56 = vld [vmem:[%s5466_s2 + $0x160] ss:$8 sps:$4 sm:$0xff]  }
 0x10b   :  { %2128 = vmatpush1.bf16.msra.mxu0 %v3948_v52  ;;  %v4001_v52 = vld [vmem:[%s5466_s2 + $0x164] ss:$8 sps:$4 sm:$0xff]  }
 0x10c   :  { %2129 = vmatprep.subr.bf16.mxu0 %v3953_v55 }
 0x10d   :  { %3012 = vmatpush1.bf16.msra.mxu1 %v4002_v57 }
 0x10e   :  { %3013 = vmatprep.subr.bf16.mxu1 %v4010_v60 }
 0x10f   :  { %2130 = vmatpush1.bf16.msra.mxu0 %v3951_v61  ;;  %v4007_v61 = vld [vmem:[%s5466_s2 + $0x154] ss:$8 sps:$4 sm:$0xff]  }
 0x110   :  { %2131 = vmatprep.subr.bf16.mxu0 %v3956_v0 }
 0x111   :  { %3014 = vmatpush1.bf16.msra.mxu1 %v4008_v1 }
 0x112   :  { %3015 = vmatprep.subr.bf16.mxu1 %v4016_v2 }
 0x113   :  { %2132 = vmatpush1.bf16.msra.mxu0 %v3954_v3 }
 0x114   :  { %2133 = vmatprep.subr.bf16.mxu0 %v3959_v4 }
 0x115   :  { %3016 = vmatpush1.bf16.msra.mxu1 %v4014_v5  ;;  %v4005_v5 = vld [vmem:[%s5466_s2 + $0x150] ss:$8 sps:$4 sm:$0xff]  }
 0x116   :  { %3017 = vmatprep.subr.bf16.mxu1 %v4022_v6 }
 0x117   :  { %2134 = vmatpush1.bf16.msra.mxu0 %v3957_v7 }
 0x118   :  { %2135 = vmatprep.subr.bf16.mxu0 %v3962_v8  ;;  %v4013_v8 = vld [vmem:[%s5466_s2 + $0x144] ss:$8 sps:$4 sm:$0xff]  }
 0x119   :  { %3018 = vmatpush1.bf16.msra.mxu1 %v4020_v9 }
 0x11a   :  { %3019 = vmatprep.subr.bf16.mxu1 %v4028_v10 }
 0x11b   :  { %2136 = vmatpush1.bf16.msra.mxu0 %v3960_v11 }
 0x11c   :  { %2137 = vmatprep.subr.bf16.mxu0 %v3965_v12 }
 0x11d   :  { %3020 = vmatpush1.bf16.msra.mxu1 %v4026_v13 }
 0x11e   :  { %3021 = vmatprep.subr.bf16.mxu1 %v4034_v14 }
 0x11f   :  { %2138 = vmatpush1.bf16.msra.mxu0 %v3963_v15 }
 0x120   :  { %2139 = vmatprep.subr.bf16.mxu0 %v3968_v16 }
 0x121   :  { %3022 = vmatpush1.bf16.msra.mxu1 %v4032_v17  ;;  %v4011_v17 = vld [vmem:[%s5466_s2 + $0x140] ss:$8 sps:$4 sm:$0xff]  }
 0x122   :  { %3023 = vmatprep.subr.bf16.mxu1 %v4040_v18 }
 0x123   :  { %2140 = vmatpush2.bf16.msra.mxu0 %v3966_v19 }
 0x124   :  { %2141 = vmatprep.subr.bf16.mxu0 %v3971_v20 }
 0x125   :  { %3024 = vmatpush2.bf16.msra.mxu1 %v4038_v21 }
 0x126   :  { %3025 = vmatprep.subr.bf16.mxu1 %v4046_v22  ;;  %v4019_v22 = vld [vmem:[%s5466_s2 + $0x134] ss:$8 sps:$4 sm:$0xff]  }
 0x127   :  { %2142 = vmatpush2.bf16.msra.mxu0 %v3969_v23 }
 0x128   :  { %2143 = vmatprep.subr.bf16.mxu0 %v3974_v24 }
 0x129   :  { %3026 = vmatpush2.bf16.msra.mxu1 %v4044_v25 }
 0x12a   :  { %3027 = vmatprep.subr.bf16.mxu1 %v4052_v26 }
 0x12b   :  { %2144 = vmatpush2.bf16.msra.mxu0 %v3972_v27  ;;  %v4017_v27 = vld [vmem:[%s5466_s2 + $0x130] ss:$8 sps:$4 sm:$0xff]  }
 0x12c   :  { %2145 = vmatprep.subr.bf16.mxu0 %v3977_v28 }
 0x12d   :  { %3028 = vmatpush2.bf16.msra.mxu1 %v4050_v29 }
 0x12e   :  { %3029 = vmatprep.subr.bf16.mxu1 %v4058_v30 }
 0x12f   :  { %2146 = vmatpush2.bf16.msra.mxu0 %v3975_v31 }
 0x130   :  { %2147 = vmatprep.subr.bf16.mxu0 %v3980_v32  ;;  %v4025_v32 = vld [vmem:[%s5466_s2 + $0x124] ss:$8 sps:$4 sm:$0xff]  }
 0x131   :  { %3030 = vmatpush2.bf16.msra.mxu1 %v4056_v33 }
 0x132   :  { %3031 = vmatprep.subr.bf16.mxu1 %v4064_v34 }
 0x133   :  { %2148 = vmatpush2.bf16.msra.mxu0 %v3978_v35 }
 0x134   :  { %2149 = vmatprep.subr.bf16.mxu0 %v3983_v36 }
 0x135   :  { %3032 = vmatpush2.bf16.msra.mxu1 %v4062_v37  ;;  %v4023_v37 = vld [vmem:[%s5466_s2 + $0x120] ss:$8 sps:$4 sm:$0xff]  }
 0x136   :  { %3033 = vmatprep.subr.bf16.mxu1 %v4070_v38 }
 0x137   :  { %2150 = vmatpush2.bf16.msra.mxu0 %v3981_v39 }
 0x138   :  { %2151 = vmatprep.subr.bf16.mxu0 %v3986_v40 }
 0x139   :  { %3034 = vmatpush2.bf16.msra.mxu1 %v4068_v41 }
 0x13a   :  { %3035 = vmatprep.subr.bf16.mxu1 %v4076_v42  ;;  %v4031_v42 = vld [vmem:[%s5466_s2 + $0x114] ss:$8 sps:$4 sm:$0xff]  }
 0x13b   :  { %2152 = vmatpush2.bf16.msra.mxu0 %v3984_v62 }
 0x13c   :  { %2153 = vmatprep.subr.bf16.mxu0 %v3989_v63 }
 0x13d   :  { %3036 = vmatpush2.bf16.msra.mxu1 %v4074_v47  ;;  %v4029_v47 = vld [vmem:[%s5466_s2 + $0x110] ss:$8 sps:$4 sm:$0xff]  }
 0x13e   :  { %3037 = vmatprep.subr.bf16.mxu1 %v4082_v48  ;;  %v4037_v48 = vld [vmem:[%s5466_s2 + $0x104] ss:$8 sps:$4 sm:$0xff]  }
 0x13f   :  { %2154 = vmatpush2.bf16.msra.mxu0 %v3987_v58  ;;  %v4035_v58 = vld [vmem:[%s5466_s2 + $0x100] ss:$8 sps:$4 sm:$0xff]  }
 0x140   :  { %3048 = vmatprep.subr.bf16.mxu0 %v3995_v49  ;;  %v4043_v49 = vld [vmem:[%s5466_s2 + $0x1f4] ss:$8 sps:$4 sm:$0xff]  }
 0x141   :  { %3038 = vmatpush2.bf16.msra.mxu1 %v4080_v45  ;;  %v4041_v45 = vld [vmem:[%s5466_s2 + $0x1f0] ss:$8 sps:$4 sm:$0xff]  }
 0x142   :  { %v1911_v53 = vpop.f32.mrf.mxu0  ;;  %2156 = vmatmul.mubr.bf16.vlgmr.msra.gmra.mxu0 %v4505_v43 }
 0x143   :  { %v5215_v54 = vpop.f32.mrf.mxu1  ;;  %v1912_v55 = vadd.f32 %v1911_v53, %v5026_v44  ;;  %3049 = vmatpush1.bf16.msra.mxu0 %v3993_v50  ;;  %v4049_v50 = vld [vmem:[%s5466_s2 + $0x1e4] ss:$8 sps:$4 sm:$0xff]   ;;  %v4055_v53 = vld [vmem:[%s5466_s2 + $0x1d4] ss:$8 sps:$4 sm:$0xff]  }
 0x144   :  { %v1913_v57 = vpop.f32.mrf.mxu0  ;;  %3050 = vmatprep.subr.bf16.mxu0 %v4001_v52  ;;  %v4047_v52 = vld [vmem:[%s5466_s2 + $0x1e0] ss:$8 sps:$4 sm:$0xff]  }
 0x145   :  { %v5221_v60 = vpop.f32.mrf.mxu1  ;;  %v1914_v0 = vadd.f32 %v1913_v57, %v5038_v59  ;;  %v4088_v59 = vld [vmem:[%s5466_s2 + $0x274] ss:$8 sps:$4 sm:$0xff]   ;;  %v4059_v57 = vld [vmem:[%s5466_s2 + $0x1c0] ss:$8 sps:$4 sm:$0xff]  }
 0x146   :  { %v1915_v43 = vpop.f32.mrf.mxu0  ;;  %3089 = vmatprep.subr.bf16.mxu1 %v4088_v59 }
 0x147   :  { %v1956_v1 = vpop.f32.mrf.mxu1  ;;  %v2172_v2 = vcombine.low %v1912_v55, %v1914_v0  ;;  %v2173_v44 = vcombine.high %v1912_v55, %v1914_v0  ;;  %v3448_v3 = vcombine.low %v1914_v0, %v1914_v0  ;;  %v3451_v4 = vcombine.high %v1914_v0, %v1914_v0  ;;  %3051 = vmatpush1.bf16.msra.mxu0 %v3999_v56  ;;  %v4053_v55 = vld [vmem:[%s5466_s2 + $0x1d0] ss:$8 sps:$4 sm:$0xff]   ;;  %v4061_v56 = vld [vmem:[%s5466_s2 + $0x1c4] ss:$8 sps:$4 sm:$0xff]  }
 0x148   :  { %v1916_v6 = vpop.f32.mrf.mxu0  ;;  %3052 = vmatprep.subr.bf16.mxu0 %v4007_v61  ;;  %v4067_v61 = vld [vmem:[%s5466_s2 + $0x1b4] ss:$8 sps:$4 sm:$0xff]   ;;  %v4065_v0 = vld [vmem:[%s5466_s2 + $0x1b0] ss:$8 sps:$4 sm:$0xff]   ;;  %v4073_v43 = vld [vmem:[%s5466_s2 + $0x1a4] ss:$8 sps:$4 sm:$0xff]  }
 0x149   :  { %v1957_v7 = vpop.f32.mrf.mxu1  ;;  %v2197_v9 = vsel %vm2196_vm0, %v2172_v2, 0.0  ;;  %v2204_v10 = vsel %vm2196_vm0, %v3448_v3, 0.0  ;;  %v2239_v11 = vsel %vm2196_vm0, %v2173_v44, 0.0  ;;  %v2246_v12 = vsel %vm2196_vm0, %v3451_v4, 0.0  ;;  %v4071_v1 = vld [vmem:[%s5466_s2 + $0x1a0] ss:$8 sps:$4 sm:$0xff]  }
 0x14a   :  { %v2198_v13 = vrot.slane %v2197_v9, 4  ;;  %v2205_v14 = vrot.slane %v2204_v10, 4  ;;  %v2240_v15 = vrot.slane %v2239_v11, 4  ;;  %v2247_v16 = vrot.slane %v2246_v12, 4  ;;  %v4079_v2 = vld [vmem:[%s5466_s2 + $0x194] ss:$8 sps:$4 sm:$0xff]  }
 0x14b   :  { %3053 = vmatpush1.bf16.msra.mxu0 %v4005_v5  ;;  %v4077_v44 = vld [vmem:[%s5466_s2 + $0x190] ss:$8 sps:$4 sm:$0xff]   ;;  %v4085_v3 = vld [vmem:[%s5466_s2 + $0x184] ss:$8 sps:$4 sm:$0xff]   ;;  %v4083_v4 = vld [vmem:[%s5466_s2 + $0x180] ss:$8 sps:$4 sm:$0xff]  }
 0x14c   :  { %v2199_v18 = vadd.f32 %v2198_v13, %v2197_v9  ;;  %v2206_v19 = vadd.f32 %v2205_v14, %v2204_v10  ;;  %v2241_v20 = vadd.f32 %v2240_v15, %v2239_v11  ;;  %v2248_v21 = vadd.f32 %v2247_v16, %v2246_v12  ;;  %3054 = vmatprep.subr.bf16.mxu0 %v4013_v8 }
 0x14e   :  { %v2200_v23 = vrot.slane %v2199_v18, 2  ;;  %v2207_v24 = vrot.slane %v2206_v19, 2  ;;  %v2242_v25 = vrot.slane %v2241_v20, 2  ;;  %v2249_v26 = vrot.slane %v2248_v21, 2 }
 0x14f   :  { %3055 = vmatpush1.bf16.msra.mxu0 %v4011_v17 }
 0x150   :  { %v2201_v28 = vadd.f32 %v2200_v23, %v2199_v18  ;;  %v2208_v29 = vadd.f32 %v2207_v24, %v2206_v19  ;;  %v2243_v30 = vadd.f32 %v2242_v25, %v2241_v20  ;;  %v2250_v31 = vadd.f32 %v2249_v26, %v2248_v21  ;;  %3056 = vmatprep.subr.bf16.mxu0 %v4019_v22 }
 0x152   :  { %v2202_v33 = vrot.slane %v2201_v28, 1  ;;  %v2209_v34 = vrot.slane %v2208_v29, 1  ;;  %v2244_v35 = vrot.slane %v2243_v30, 1  ;;  %v2251_v36 = vrot.slane %v2250_v31, 1 }
 0x153   :  { %3057 = vmatpush1.bf16.msra.mxu0 %v4017_v27 }
 0x154   :  { %v5255_v38 = vadd.f32 %v2202_v33, %v2201_v28  ;;  %v5257_v39 = vadd.f32 %v2209_v34, %v2208_v29  ;;  %v5259_v40 = vadd.f32 %v2244_v35, %v2243_v30  ;;  %v5261_v41 = vadd.f32 %v2251_v36, %v2250_v31  ;;  %3058 = vmatprep.subr.bf16.mxu0 %v4025_v32 }
 0x156   :  { %v2293_v62 = vcombine.low %v5255_v38, %v5257_v39  ;;  %v2318_v63 = vcombine.low %v5259_v40, %v5261_v41 }
 0x157   :  { %3059 = vmatpush1.bf16.msra.mxu0 %v4023_v37 }
 0x158   :  { %3060 = vmatprep.subr.bf16.mxu0 %v4031_v42 }
 0x15b   :  { %3061 = vmatpush1.bf16.msra.mxu0 %v4029_v47 }
 0x15c   :  { %3062 = vmatprep.subr.bf16.mxu0 %v4037_v48 }
 0x15f   :  { %3063 = vmatpush1.bf16.msra.mxu0 %v4035_v58 }
 0x160   :  { %3064 = vmatprep.subr.bf16.mxu0 %v4043_v49 }
 0x163   :  { %3065 = vmatpush2.bf16.msra.mxu0 %v4041_v45 }
 0x164   :  { %3066 = vmatprep.subr.bf16.mxu0 %v4049_v50 }
 0x167   :  { %3067 = vmatpush2.bf16.msra.mxu0 %v4047_v52 }
 0x168   :  { %3068 = vmatprep.subr.bf16.mxu0 %v4055_v53 }
 0x16b   :  { %3069 = vmatpush2.bf16.msra.mxu0 %v4053_v55 }
 0x16c   :  { %3070 = vmatprep.subr.bf16.mxu0 %v4061_v56  ;;  %v2301_v56 = vrot.slane %v2293_v62, %v4330_v51 }
 0x16f   :  { %3071 = vmatpush2.bf16.msra.mxu0 %v4059_v57  ;;  %v2326_v57 = vrot.slane %v2318_v63, %v4330_v51 }
 0x170   :  { %3072 = vmatprep.subr.bf16.mxu0 %v4067_v61 }
 0x173   :  { %3073 = vmatpush2.bf16.msra.mxu0 %v4065_v0 }
 0x174   :  { %3074 = vmatprep.subr.bf16.mxu0 %v4073_v43 }
 0x177   :  { %3075 = vmatpush2.bf16.msra.mxu0 %v4071_v1 }
 0x178   :  { %3076 = vmatprep.subr.bf16.mxu0 %v4079_v2 }
 0x17b   :  { %3077 = vmatpush2.bf16.msra.mxu0 %v4077_v44 }
 0x17c   :  { %3078 = vmatprep.subr.bf16.mxu0 %v4085_v3 }
 0x17f   :  { %3079 = vmatpush2.bf16.msra.mxu0 %v4083_v4 }
 0x182   :  { %v1993_v5 = vpop.f32.mrf.mxu0 }
 0x183   :  { %v2034_v6 = vpop.f32.mrf.mxu1  ;;  %v1994_v7 = vadd.f32 %v1993_v5, %v5215_v54 }
 0x184   :  { %v1995_v8 = vpop.f32.mrf.mxu0 }
 0x185   :  { %v2036_v59 = vpop.f32.mrf.mxu1  ;;  %v1996_v9 = vadd.f32 %v1995_v8, %v5221_v60  ;;  %v2035_v12 = vadd.f32 %v2034_v6, %v1994_v7  ;;  %v4086_v8 = vld [vmem:[%s5466_s2 + $0x270] ss:$8 sps:$4 sm:$0xff]  }
 0x186   :  { %v1997_v10 = vpop.f32.mrf.mxu0 }
 0x187   :  { %v2038_v11 = vpop.f32.mrf.mxu1  ;;  %v2037_v13 = vadd.f32 %v2036_v59, %v1996_v9  ;;  %v4091_v9 = vld [vmem:[%s5466_s2 + $0x264] ss:$8 sps:$4 sm:$0xff]  }
 0x188   :  { %v1998_v14 = vpop.f32.mrf.mxu0 }
 0x189   :  { %v2039_v15 = vpop.f32.mrf.mxu1  ;;  %v2174_v16 = vcombine.low %v2035_v12, %v2037_v13  ;;  %v2175_v17 = vcombine.high %v2035_v12, %v2037_v13  ;;  %v3449_v18 = vcombine.low %v2037_v13, %v2037_v13  ;;  %v3452_v19 = vcombine.high %v2037_v13, %v2037_v13  ;;  %v4089_v12 = vld [vmem:[%s5466_s2 + $0x260] ss:$8 sps:$4 sm:$0xff]   ;;  %v4094_v13 = vld [vmem:[%s5466_s2 + $0x254] ss:$8 sps:$4 sm:$0xff]   ;;  %v4092_v14 = vld [vmem:[%s5466_s2 + $0x250] ss:$8 sps:$4 sm:$0xff]  }
 0x18a   :  { %v4097_v15 = vld [vmem:[%s5466_s2 + $0x244] ss:$8 sps:$4 sm:$0xff]  }
 0x18b   :  { %v2211_v20 = vsel %vm2196_vm0, %v2174_v16, 0.0  ;;  %v2218_v21 = vsel %vm2196_vm0, %v3449_v18, 0.0  ;;  %v2253_v54 = vsel %vm2196_vm0, %v2175_v17, 0.0  ;;  %v2260_v22 = vsel %vm2196_vm0, %v3452_v19, 0.0  ;;  %v4095_v16 = vld [vmem:[%s5466_s2 + $0x240] ss:$8 sps:$4 sm:$0xff]  }
 0x18c   :  { %v2212_v23 = vrot.slane %v2211_v20, 4  ;;  %v2219_v60 = vrot.slane %v2218_v21, 4  ;;  %v2254_v24 = vrot.slane %v2253_v54, 4  ;;  %v2261_v25 = vrot.slane %v2260_v22, 4  ;;  %v4100_v17 = vld [vmem:[%s5466_s2 + $0x234] ss:$8 sps:$4 sm:$0xff]  }
 0x18d   :  { %v4098_v18 = vld [vmem:[%s5466_s2 + $0x230] ss:$8 sps:$4 sm:$0xff]   ;;  %v4103_v19 = vld [vmem:[%s5466_s2 + $0x224] ss:$8 sps:$4 sm:$0xff]  }
 0x18e   :  { %v2213_v26 = vadd.f32 %v2212_v23, %v2211_v20  ;;  %v2220_v27 = vadd.f32 %v2219_v60, %v2218_v21  ;;  %v2255_v28 = vadd.f32 %v2254_v24, %v2253_v54  ;;  %v2262_v29 = vadd.f32 %v2261_v25, %v2260_v22  ;;  %v4101_v54 = vld [vmem:[%s5466_s2 + $0x220] ss:$8 sps:$4 sm:$0xff]   ;;  %v4106_v23 = vld [vmem:[%s5466_s2 + $0x214] ss:$8 sps:$4 sm:$0xff]  }
 0x190   :  { %v2214_v30 = vrot.slane %v2213_v26, 2  ;;  %v2221_v31 = vrot.slane %v2220_v27, 2  ;;  %v2256_v32 = vrot.slane %v2255_v28, 2  ;;  %v2263_v33 = vrot.slane %v2262_v29, 2 }
 0x192   :  { %v2215_v34 = vadd.f32 %v2214_v30, %v2213_v26  ;;  %v2222_v35 = vadd.f32 %v2221_v31, %v2220_v27  ;;  %v2257_v36 = vadd.f32 %v2256_v32, %v2255_v28  ;;  %v2264_v37 = vadd.f32 %v2263_v33, %v2262_v29  ;;  %v4104_v27 = vld [vmem:[%s5466_s2 + $0x210] ss:$8 sps:$4 sm:$0xff]   ;;  %v4109_v28 = vld [vmem:[%s5466_s2 + $0x204] ss:$8 sps:$4 sm:$0xff]   ;;  %v4107_v31 = vld [vmem:[%s5466_s2 + $0x200] ss:$8 sps:$4 sm:$0xff]  }
 0x193   :  { %v4112_v32 = vld [vmem:[%s5466_s2 + $0x2f4] ss:$8 sps:$4 sm:$0xff]   ;;  %v4110_v33 = vld [vmem:[%s5466_s2 + $0x2f0] ss:$8 sps:$4 sm:$0xff]  }
 0x194   :  { %v2216_v42 = vrot.slane %v2215_v34, 1  ;;  %v2223_v47 = vrot.slane %v2222_v35, 1  ;;  %v2258_v48 = vrot.slane %v2257_v36, 1  ;;  %v2265_v58 = vrot.slane %v2264_v37, 1 }
 0x196   :  { %v2217_v49 = vadd.f32 %v2216_v42, %v2215_v34  ;;  %v2224_v45 = vadd.f32 %v2223_v47, %v2222_v35  ;;  %v2259_v50 = vadd.f32 %v2258_v48, %v2257_v36  ;;  %v2266_v52 = vadd.f32 %v2265_v58, %v2264_v37  ;;  %v4115_v34 = vld [vmem:[%s5466_s2 + $0x2e4] ss:$8 sps:$4 sm:$0xff]   ;;  %v4113_v35 = vld [vmem:[%s5466_s2 + $0x2e0] ss:$8 sps:$4 sm:$0xff]   ;;  %v4118_v36 = vld [vmem:[%s5466_s2 + $0x2d4] ss:$8 sps:$4 sm:$0xff]  }
 0x197   :  { %v4116_v37 = vld [vmem:[%s5466_s2 + $0x2d0] ss:$8 sps:$4 sm:$0xff]   ;;  %v4121_v42 = vld [vmem:[%s5466_s2 + $0x2c4] ss:$8 sps:$4 sm:$0xff]   ;;  %v4119_v47 = vld [vmem:[%s5466_s2 + $0x2c0] ss:$8 sps:$4 sm:$0xff]  }
 0x198   :  { %v2294_v53 = vcombine.low %v2217_v49, %v2224_v45  ;;  %v2319_v55 = vcombine.low %v2259_v50, %v2266_v52  ;;  %v4124_v48 = vld [vmem:[%s5466_s2 + $0x2b4] ss:$8 sps:$4 sm:$0xff]   ;;  %v4122_v58 = vld [vmem:[%s5466_s2 + $0x2b0] ss:$8 sps:$4 sm:$0xff]   ;;  %v4127_v49 = vld [vmem:[%s5466_s2 + $0x2a4] ss:$8 sps:$4 sm:$0xff]  }
 0x199   :  { %v4125_v45 = vld [vmem:[%s5466_s2 + $0x2a0] ss:$8 sps:$4 sm:$0xff]   ;;  %v4130_v50 = vld [vmem:[%s5466_s2 + $0x294] ss:$8 sps:$4 sm:$0xff]   ;;  %v4128_v52 = vld [vmem:[%s5466_s2 + $0x290] ss:$8 sps:$4 sm:$0xff]  }
 0x19a   :  { %v2308_v61 = vrot.slane %v2294_v53, %v4330_v51  ;;  %v2333_v0 = vrot.slane %v2319_v55, %v4330_v51  ;;  %v4133_v53 = vld [vmem:[%s5466_s2 + $0x284] ss:$8 sps:$4 sm:$0xff]   ;;  %v4131_v55 = vld [vmem:[%s5466_s2 + $0x280] ss:$8 sps:$4 sm:$0xff]  }
 0x19c   :  { %v2309_v43 = vcombine.low %v2301_v56, %v2308_v61  ;;  %v2334_v1 = vcombine.low %v2326_v57, %v2333_v0 }
 0x19e   :  { %v2347_v2 = vrot.slane %v2334_v1, 7 }
 0x1a0   :  { %v2349_v44 = vsel %vm2348_vm1, %v2347_v2, %v2309_v43 }
 0x1a1   :  { %v2351_v38 = vsel %vm2350_vm2, %v2347_v2, %v2349_v44 }
 0x1a2   :  { %v2353_v39 = vsel %vm2352_vm3, %v2347_v2, %v2351_v38 }
 0x1a3   :  { %v2355_v40 = vsel %vm2354_vm4, %v2347_v2, %v2353_v39 }
 0x1a4   :  { %v2374_v41 = vmul.f32 0.25, %v2355_v40 }
 0x1a6   :  { %v2376_v62 = vmax.f32 %v2374_v41, 0.0 }
 0x1a8   :  { %v2389_v63 = vrot.slane %v2376_v62, %v4330_v51  ;;  %2378 = vst [vmem:[#allocation3] sm:$0xff] %v2376_v62  ;;  %v2382_v3 = vcombine.high %v2376_v62, %v2376_v62 }
 0x1aa   :  { %v2397_v4 = vcombine.high %v2389_v63, %v2389_v63  ;;  %v2396_v5 = vrot.slane %v2382_v3, %v4330_v51  ;;  %v2413_v59 = vpack.c.bf16 %v2389_v63, %v2389_v63 }
 0x1ac   :  { %v2414_v6 = vpack.c.bf16 %v2397_v4, %v2397_v4  ;;  %v2398_v7 = vcombine.high %v2396_v5, %v2396_v5  ;;  %v2415_v11 = vpack.c.bf16 %v2396_v5, %v2396_v5 }
 0x1ae   :  { %3039 = vmatprep.mubr.bf16.mxu1 %v2414_v6  ;;  %v2416_v10 = vpack.c.bf16 %v2398_v7, %v2398_v7 }
 0x1af   :  { %3040 = vmatmul.mubr.bf16.vlgmr.msra.gmra.mxu1 %v2413_v59 }
 0x1b0   :  { %3080 = vmatprep.mubr.bf16.mxu0 %v2416_v10  ;;  %3090 = vmatpush1.bf16.msra.mxu1 %v4086_v8 }
 0x1b1   :  { %3081 = vmatmul.mubr.bf16.vlgmr.msra.gmra.mxu0 %v2415_v11  ;;  %3091 = vmatprep.subr.bf16.mxu1 %v4091_v9 }
 0x1b4   :  { %3092 = vmatpush1.bf16.msra.mxu1 %v4089_v12 }
 0x1b5   :  { %3093 = vmatprep.subr.bf16.mxu1 %v4094_v13 }
 0x1b8   :  { %3094 = vmatpush1.bf16.msra.mxu1 %v4092_v14 }
 0x1b9   :  { %3095 = vmatprep.subr.bf16.mxu1 %v4097_v15 }
 0x1bc   :  { %3096 = vmatpush1.bf16.msra.mxu1 %v4095_v16 }
 0x1bd   :  { %3097 = vmatprep.subr.bf16.mxu1 %v4100_v17 }
 0x1c0   :  { %3098 = vmatpush1.bf16.msra.mxu1 %v4098_v18 }
 0x1c1   :  { %3099 = vmatprep.subr.bf16.mxu1 %v4103_v19 }
 0x1c2   :  { %v2075_v20 = vpop.f32.mrf.mxu0 }
 0x1c3   :  { %v2116_v21 = vpop.f32.mrf.mxu1 }
 0x1c4   :  { %v2117_v22 = vadd.f32 %v2116_v21, %v2075_v20  ;;  %v2077_v60 = vpop.f32.mrf.mxu0  ;;  %3100 = vmatpush1.bf16.msra.mxu1 %v4101_v54 }
 0x1c5   :  { %v2118_v24 = vpop.f32.mrf.mxu1  ;;  %3101 = vmatprep.subr.bf16.mxu1 %v4106_v23 }
 0x1c6   :  { %v2079_v25 = vpop.f32.mrf.mxu0  ;;  %v2119_v57 = vadd.f32 %v2118_v24, %v2077_v60 }
 0x1c7   :  { %v2120_v26 = vpop.f32.mrf.mxu1 }
 0x1c8   :  { %v2080_v29 = vpop.f32.mrf.mxu0  ;;  %3102 = vmatpush1.bf16.msra.mxu1 %v4104_v27 }
 0x1c9   :  { %v2121_v30 = vpop.f32.mrf.mxu1  ;;  %3103 = vmatprep.subr.bf16.mxu1 %v4109_v28 }
 0x1cc   :  { %3104 = vmatpush1.bf16.msra.mxu1 %v4107_v31  ;;  %v2165_v31 = vld [vmem:[#allocation2 + $0x8] sm:$0xf] }
 0x1cd   :  { %3105 = vmatprep.subr.bf16.mxu1 %v4112_v32 }
 0x1d0   :  { %3106 = vmatpush2.bf16.msra.mxu1 %v4110_v33 }
 0x1d1   :  { %3107 = vmatprep.subr.bf16.mxu1 %v4115_v34 }
 0x1d4   :  { %3108 = vmatpush2.bf16.msra.mxu1 %v4113_v35 }
 0x1d5   :  { %3109 = vmatprep.subr.bf16.mxu1 %v4118_v36 }
 0x1d8   :  { %3110 = vmatpush2.bf16.msra.mxu1 %v4116_v37 }
 0x1d9   :  { %3111 = vmatprep.subr.bf16.mxu1 %v4121_v42 }
 0x1dc   :  { %3112 = vmatpush2.bf16.msra.mxu1 %v4119_v47 }
 0x1dd   :  { %3113 = vmatprep.subr.bf16.mxu1 %v4124_v48 }
 0x1e0   :  { %3114 = vmatpush2.bf16.msra.mxu1 %v4122_v58 }
 0x1e1   :  { %3115 = vmatprep.subr.bf16.mxu1 %v4127_v49 }
 0x1e4   :  { %3116 = vmatpush2.bf16.msra.mxu1 %v4125_v45  ;;  %v2519_v45 = vsub.s32 0, %v4315_v46 }
 0x1e5   :  { %3117 = vmatprep.subr.bf16.mxu1 %v4130_v50  ;;  %v2515_v50 = vld [vmem:[%s5467_s3] sm:$0x3]  ;;  %s4134_s3 = scalar_lea.vmem %s3151_s16, 192 }
 0x1e6   :  { %p4135_p0 = scmp.ne.s32.totalorder %s3151_s16, %s4134_s3  ;;  %p4140_p2 = scmp.lt.s32.totalorder %s4134_s3, %s4134_s3 }
 0x1e8   :  { %3118 = vmatpush2.bf16.msra.mxu1 %v4128_v52  ;;  %v2523_v52 = vsub.s32 1, %v4315_v46  ;;  %p4141_p3 = por %p4140_p2, %p4139_p1 }
 0x1e9   :  { %3119 = vmatprep.subr.bf16.mxu1 %v4133_v53  ;;  %v2520_v53 = vrot.slane %v2515_v50, %v2519_v45 }
 0x1ea   :  { %p4142_p4 = pnand %p4141_p3, %p4135_p0 }
 0x1ec   :  { %3120 = vmatpush2.bf16.msra.mxu1 %v4131_v55  ;;  %v2524_v55 = vrot.slane %v2515_v50, %v2523_v52 }
 0x202   :  { %v2157_v56 = vpop.f32.mrf.mxu0 }
 0x203   :  { %v2158_v0 = vadd.f32 %v2157_v56, %v2117_v22 }
 0x204   :  { %v2159_v61 = vpop.f32.mrf.mxu0 }
 0x205   :  { %v2160_v43 = vadd.f32 %v2159_v61, %v2119_v57 }
 0x206   :  { %v2161_v1 = vpop.f32.mrf.mxu0 }
 0x207   :  { %v2176_v2 = vcombine.low %v2158_v0, %v2160_v43  ;;  %v2177_v44 = vcombine.high %v2158_v0, %v2160_v43  ;;  %v3450_v38 = vcombine.low %v2160_v43, %v2160_v43  ;;  %v3453_v39 = vcombine.high %v2160_v43, %v2160_v43 }
 0x208   :  { %v2162_v40 = vpop.f32.mrf.mxu0 }
 0x209   :  { %v2225_v41 = vsel %vm2196_vm0, %v2176_v2, 0.0  ;;  %v2232_v62 = vsel %vm2196_vm0, %v3450_v38, 0.0  ;;  %v2267_v63 = vsel %vm2196_vm0, %v2177_v44, 0.0  ;;  %v2274_v3 = vsel %vm2196_vm0, %v3453_v39, 0.0 }
 0x20a   :  { %v2226_v4 = vrot.slane %v2225_v41, 4  ;;  %v2233_v5 = vrot.slane %v2232_v62, 4  ;;  %v2268_v6 = vrot.slane %v2267_v63, 4  ;;  %v2275_v7 = vrot.slane %v2274_v3, 4 }
 0x20c   :  { %v2227_v8 = vadd.f32 %v2226_v4, %v2225_v41  ;;  %v2234_v59 = vadd.f32 %v2233_v5, %v2232_v62  ;;  %v2269_v9 = vadd.f32 %v2268_v6, %v2267_v63  ;;  %v2276_v10 = vadd.f32 %v2275_v7, %v2274_v3 }
 0x20e   :  { %v2228_v11 = vrot.slane %v2227_v8, 2  ;;  %v2235_v12 = vrot.slane %v2234_v59, 2  ;;  %v2270_v13 = vrot.slane %v2269_v9, 2  ;;  %v2277_v14 = vrot.slane %v2276_v10, 2 }
 0x210   :  { %v2229_v15 = vadd.f32 %v2228_v11, %v2227_v8  ;;  %v2236_v16 = vadd.f32 %v2235_v12, %v2234_v59  ;;  %v2271_v17 = vadd.f32 %v2270_v13, %v2269_v9  ;;  %v2278_v18 = vadd.f32 %v2277_v14, %v2276_v10 }
 0x212   :  { %v2230_v19 = vrot.slane %v2229_v15, 1  ;;  %v2237_v20 = vrot.slane %v2236_v16, 1  ;;  %v2272_v21 = vrot.slane %v2271_v17, 1  ;;  %v2279_v54 = vrot.slane %v2278_v18, 1 }
 0x214   :  { %v2231_v22 = vadd.f32 %v2230_v19, %v2229_v15  ;;  %v2238_v23 = vadd.f32 %v2237_v20, %v2236_v16  ;;  %v2273_v60 = vadd.f32 %v2272_v21, %v2271_v17  ;;  %v2280_v24 = vadd.f32 %v2279_v54, %v2278_v18 }
 0x216   :  { %v2310_v25 = vcombine.low %v2231_v22, %v2238_v23  ;;  %v2335_v26 = vcombine.low %v2273_v60, %v2280_v24 }
 0x218   :  { %v2342_v27 = vrot.slane %v2335_v26, %v4330_v51  ;;  %v2317_v28 = vrot.slane %v2310_v25, %v4330_v51 }
 0x21a   :  { %v2358_v29 = vrot.slane %v2342_v27, 7 }
 0x21c   :  { %v2359_v30 = vsel %vm2348_vm1, %v2358_v29, %v2317_v28 }
 0x21d   :  { %v2360_v32 = vsel %vm2350_vm2, %v2358_v29, %v2359_v30 }
 0x21e   :  { %v2361_v33 = vsel %vm2352_vm3, %v2358_v29, %v2360_v32 }
 0x21f   :  { %v2362_v34 = vsel %vm2354_vm4, %v2358_v29, %v2361_v33 }
 0x220   :  { %v2366_v35 = vadd.f32 %v2362_v34, %v2165_v31 }
 0x222   :  { %2368 = vst [vmem:[#allocation2 + $0x8] sm:$0xf] %v2366_v35 }
 0x229   :  { %v2373_v36 = vld [vmem:[#allocation2 + $0x8] sm:$0xf] }
 0x22a   :  { %v2375_v37 = vmul.f32 0.25, %v2373_v36 }
 0x22c   :  { %v2377_v42 = vmax.f32 %v2375_v37, 0.0 }
 0x22e   :  { %v2405_v47 = vrot.slane %v2377_v42, %v4330_v51  ;;  %2379 = vst [vmem:[#allocation3 + $0x8] sm:$0xf] %v2377_v42 }
 0x230   :  { %v2406_v48 = vcombine.high %v2405_v47, %v2405_v47  ;;  %v2417_v49 = vpack.c.bf16 %v2405_v47, %v2405_v47 }
 0x232   :  { %v2418_v58 = vpack.c.bf16 %v2406_v48, %v2406_v48 }
 0x234   :  { %3121 = vmatprep.mubr.bf16.mxu1 %v2418_v58 }
 0x235   :  { %3122 = vmatmul.mubr.bf16.vlgmr.msra.gmra.mxu1 %v2417_v49 }
 0x26f   :  { %v3041_v56 = vpop.f32.mrf.mxu1 }
 0x270   :  { %v3042_v57 = vadd.f32 %v3041_v56, %v2520_v53 }
 0x271   :  { %v3043_v61 = vpop.f32.mrf.mxu1  ;;  %v3082_v51 = vpop.f32.mrf.mxu0 }
 0x272   :  { %v3044_v0 = vadd.f32 %v3043_v61, %v2524_v55  ;;  %v3083_v43 = vadd.f32 %v3082_v51, %v3042_v57 }
 0x273   :  { %v3045_v1 = vpop.f32.mrf.mxu1  ;;  %v3084_v2 = vpop.f32.mrf.mxu0 }
 0x274   :  { %v3085_v44 = vadd.f32 %v3084_v2, %v3044_v0 }
 0x275   :  { %v3046_v38 = vpop.f32.mrf.mxu1  ;;  %v3086_v39 = vpop.f32.mrf.mxu0 }
 0x277   :  { %v3087_v40 = vpop.f32.mrf.mxu0 }
 0x278   :  { %4145 = shalt.err (!%p4142_p4)
}
 0x279   :  { %3153 = dma.vmem_to_hbm [thread:$0]  %s3151_s16, 192, %s5469_s5, [#allocation4]  }
 0x2f5   :  { %v3123_v46 = vpop.f32.mrf.mxu1 }
 0x2f6   :  { %v3124_v62 = vadd.f32 %v3123_v46, %v3083_v43 }
 0x2f7   :  { %v3125_v41 = vpop.f32.mrf.mxu1 }
 0x2f8   :  { %v3126_v63 = vadd.f32 %v3125_v41, %v3085_v44 }
 0x2f9   :  { %v3127_v3 = vpop.f32.mrf.mxu1 }
 0x2fa   :  { %v3132_v4 = vcombine.low %v3124_v62, %v3126_v63 }
 0x2fb   :  { %v3128_v5 = vpop.f32.mrf.mxu1 }
 0x2fc   :  { %3550 = vst.sshfl [vmem:[%s5468_s4] sm:$0x33 pattern:$0x76325410] %v3132_v4 }
 0x2fd   :  { %4154 = dma.done.wait [#allocation4], 192  }
 0x2fe   :  { %4155 = vsyncadd [#allocation4], 4294967104 }
 0x2ff   :  { %3159 = vsyncpa [#allocation4], 1 }

</bundles_post_ra>
